<compile_context>
chip_gen: v6e
topology: v6e:2x2x1
jax: 0.10.0
libtpu: 0.0.40
codegen_flags: <defaults>
</compile_context>

<pallas_src>
import math
import numpy as np
import jax
import jax.numpy as jnp
from jax.experimental import pallas as pl
from jax.experimental.pallas import tpu as pltpu  # noqa: F401

B, T = 2, 8
BT = B * T                       # 16 rows: batch folded into sublanes
D_LATENT, D_NOISE, D_FF, N_HEADS = 32, 16, 64, 4
D_HEAD = D_LATENT // N_HEADS     # 8
HB = N_HEADS * BT                # 64 head-folded key/value rows
LN_EPS = 1e-5
ATTN_SCALE = 1.0 / math.sqrt(D_HEAD)
REF_PREC = jax.lax.Precision.HIGHEST

# ----------------------------------------------------------------------------
# Packed-parameter layout.
# Weight slab (bf16): name -> (rows, cols, col_offset). No slice crosses a
# 128-lane tile boundary.
# ----------------------------------------------------------------------------
W_LAYOUT = {
    "w_qkv":  (D_LATENT, 3 * D_LATENT, 0),      # cols   0..95
    "w_so":   (D_LATENT, D_LATENT, 96),         # cols  96..127
    "w_film": (D_NOISE, 2 * D_FF, 128),         # cols 128..255
    "rotp":   (2 * D_LATENT, 2 * D_LATENT, 256),  # cols 256..319 (64x64)
    "w_xkv":  (D_LATENT, 2 * D_LATENT, 320),    # cols 320..383
    "w_xq":   (D_LATENT, D_LATENT, 384),        # cols 384..415
    "w_xo":   (D_LATENT, D_LATENT, 416),        # cols 416..447
    "w_mlp1": (D_FF, D_LATENT, 448),            # cols 448..479
    "w_mlp0": (D_LATENT, D_FF, 512),            # cols 512..575
    "m64":    (HB, D_LATENT, 576),              # cols 576..607  head-col mask
    "segmat": (HB, HB, 640),                    # cols 640..703  segment-sum
}
W_ROWS, W_COLS = 64, 768

# Misc slab (f32): RoPE tables, additive head-x-batch mask, LN params, biases.
P_COLS = 4 * D_LATENT            # 128
ROW_ROPE = 0                     # rows [0,16):  [cos64 | sin64]
ROW_MASK = BT                    # rows [16,32): additive mask, cols [0,64)
ROW_LN1 = 2 * BT                 # [ln1_w | ln1_b]
ROW_XLN = 2 * BT + 1             # [xln_w | xln_b]
ROW_LN2 = 2 * BT + 2             # [ln2_w | ln2_b]
ROW_BMLP1 = 2 * BT + 3           # [b_mlp1 | 0]
ROW_BMLP0 = 2 * BT + 4           # b_mlp0 across cols [0,64)
P_ROWS = 40


# ----------------------------------------------------------------------------
# RoPE helper tables (rotary_embedding_torch default: interleaved pairs)
# ----------------------------------------------------------------------------
def make_rope_tables(seq_len, dim):
    inv_freq = 1.0 / (10000.0 ** (np.arange(0, dim, 2, dtype=np.float64) / dim))
    freqs = np.outer(np.arange(seq_len, dtype=np.float64), inv_freq)  # (T, dim/2)
    freqs = np.repeat(freqs, 2, axis=-1)                              # (T, dim)
    return np.cos(freqs).astype(np.float32), np.sin(freqs).astype(np.float32)


def make_rotate_half_matrix(dim):
    # y = x @ P  <=>  y[2i] = -x[2i+1], y[2i+1] = x[2i]  (interleaved rotate_half)
    # Pairs never straddle head or q|k boundaries (all even), so one (dim,dim)
    # matrix applies the rotation to every head of q and k simultaneously.
    p = np.zeros((dim, dim), np.float32)
    for i in range(dim // 2):
        p[2 * i + 1, 2 * i] = -1.0
        p[2 * i, 2 * i + 1] = 1.0
    return p


# ----------------------------------------------------------------------------
# Pallas kernel: whole block, both batch elements, all heads, one invocation.
# ----------------------------------------------------------------------------
def _transformer_block_kernel(x_ref, cond_ref, noise_ref, w_ref, p_ref, out_ref):
    x = x_ref[...]            # (BT, D_LATENT)
    cond = cond_ref[...]      # (BT, D_LATENT)
    noise = noise_ref[...]    # (B, D_NOISE)

    def wmat(name):
        r, c, o = W_LAYOUT[name]
        return w_ref[0:r, o:o + c].astype(jnp.float32)   # bf16 slab -> f32

    def pvec(row, lo, hi):
        return p_ref[row:row + 1, lo:hi]

    def mm(a, b):             # default MXU precision, f32 accumulation
        return jnp.dot(a, b, preferred_element_type=jnp.float32)

    def mm_t(a, b):           # a @ b.T without materializing a transpose
        return jax.lax.dot_general(a, b, (((1,), (1,)), ((), ())),
                                   preferred_element_type=jnp.float32)

    def layer_norm(v, w, bias):
        mu = jnp.mean(v, axis=-1, keepdims=True)
        c = v - mu
        var = jnp.mean(c * c, axis=-1, keepdims=True)
        return c * jax.lax.rsqrt(var + LN_EPS) * w + bias

    cos = p_ref[ROW_ROPE:ROW_ROPE + BT, 0:2 * D_LATENT]              # (BT, 64)
    sin = p_ref[ROW_ROPE:ROW_ROPE + BT, 2 * D_LATENT:4 * D_LATENT]   # (BT, 64)
    neg_mask = p_ref[ROW_MASK:ROW_MASK + BT, 0:HB]                   # (BT, 64) f32
    rotp = wmat("rotp")       # (64, 64) block-diag interleaved rotate-half
    m64 = wmat("m64")         # (64, 32) head-column 0/1 mask
    segmat = wmat("segmat")   # (64, 64) per-head-group 0/1 segment-sum matrix

    def rope_qk(qk):          # RoPE on q|k jointly: (BT, 2*D_LATENT)
        return qk * cos + mm(qk, rotp) * sin

    def fused_attention(q, k, v, w_out):
        # All 4 heads in one masked softmax. Keys/values are head-folded into
        # rows: k_big[h*BT + s, :] = k[s, :] restricted to head-h columns, so
        # q @ k_big.T is the (BT, N_HEADS*BT) score matrix with head h's
        # scores in lanes [h*BT, (h+1)*BT). neg_mask blocks cross-batch
        # attention; segmat broadcasts per-head-group denominators.
        k_big = jnp.concatenate([k] * N_HEADS, axis=0) * m64          # (64, 32)
        v_big = jnp.concatenate([v] * N_HEADS, axis=0) * m64          # (64, 32)
        s = mm_t(q, k_big) + neg_mask                                 # (16, 64)
        e = jnp.exp(s - jnp.max(s, axis=-1, keepdims=True))
        denom = mm(e, segmat)                                         # group sums
        p = e * pl.reciprocal(denom, approx=True)
        return mm(mm(p, v_big), w_out)                                # (16, 32)

    # ---- self-attention (+RoPE) + residual + layernorm1 ----
    qkv = mm(x, wmat("w_qkv"))                                        # (BT, 96)
    qk = rope_qk(qkv[:, 0:2 * D_LATENT])                              # q|k roped
    sattn = fused_attention(qk[:, 0:D_LATENT], qk[:, D_LATENT:2 * D_LATENT],
                            qkv[:, 2 * D_LATENT:3 * D_LATENT], wmat("w_so"))
    x1 = layer_norm(x + sattn,
                    pvec(ROW_LN1, 0, D_LATENT), pvec(ROW_LN1, D_LATENT, 2 * D_LATENT))

    # ---- cross-attention ('kv_from_cond_q_from_x') + residual + xattn LN ----
    kv = mm(cond, wmat("w_xkv"))                                      # (BT, 64)
    qk_x = rope_qk(jnp.concatenate([mm(x1, wmat("w_xq")), kv[:, 0:D_LATENT]],
                                   axis=-1))
    xattn = fused_attention(qk_x[:, 0:D_LATENT], qk_x[:, D_LATENT:2 * D_LATENT],
                            kv[:, D_LATENT:2 * D_LATENT], wmat("w_xo"))
    x2 = layer_norm(x1 + xattn,
                    pvec(ROW_XLN, 0, D_LATENT), pvec(ROW_XLN, D_LATENT, 2 * D_LATENT))

    # ---- MLP with FiLM noise conditioning (relu; dropout_p=0 -> identity) ----
    h = mm(x2, wmat("w_mlp0")) + pvec(ROW_BMLP0, 0, D_FF)
    h = jnp.maximum(h, 0.0)
    film = mm(noise, wmat("w_film"))                                  # (B, 2*D_FF)
    film_bt = jnp.concatenate(
        [jnp.broadcast_to(film[b:b + 1, :], (T, 2 * D_FF)) for b in range(B)],
        axis=0)                                                       # (BT, 2*D_FF)
    scale = film_bt[:, 0:D_FF]
    shift = film_bt[:, D_FF:2 * D_FF]
    mu = jnp.mean(h, axis=-1, keepdims=True)                          # no-affine LN
    c = h - mu
    var = jnp.mean(c * c, axis=-1, keepdims=True)
    h = c * jax.lax.rsqrt(var + LN_EPS) * (1.0 + scale) + shift
    mlp_out = mm(h, wmat("w_mlp1")) + pvec(ROW_BMLP1, 0, D_LATENT)
    out_ref[...] = layer_norm(x2 + mlp_out,
                              pvec(ROW_LN2, 0, D_LATENT),
                              pvec(ROW_LN2, D_LATENT, 2 * D_LATENT))


# ----------------------------------------------------------------------------
# Host-side parameter packing + wrapper
# ----------------------------------------------------------------------------
def pack_inputs(params, cos_head, sin_head):
    (w_qkv, w_so, ln1_w, ln1_b, w_xkv, w_xq, w_xo, xln_w, xln_b,
     w_mlp0, b_mlp0, w_film, w_mlp1, b_mlp1, ln2_w, ln2_b) = params

    # Fold the 1/sqrt(d_head) softmax scale into the Q projection weights
    # (RoPE is linear, so scaling commutes with it).
    w_qkv_s = np.asarray(w_qkv).copy()
    w_qkv_s[:, :D_LATENT] *= ATTN_SCALE
    w_xq_s = np.asarray(w_xq) * ATTN_SCALE

    rotp = make_rotate_half_matrix(2 * D_LATENT)     # (64,64) for joint q|k RoPE
    m64 = np.zeros((HB, D_LATENT), np.float32)       # head-column 0/1 mask
    for h in range(N_HEADS):
        m64[h * BT:(h + 1) * BT, h * D_HEAD:(h + 1) * D_HEAD] = 1.0
    segmat = np.kron(np.eye(N_HEADS, dtype=np.float32),
                     np.ones((BT, BT), np.float32))  # (64,64) group-sum matrix

    mats = {"w_qkv": w_qkv_s, "w_so": w_so, "w_film": w_film, "rotp": rotp,
            "w_xkv": w_xkv, "w_xq": w_xq_s, "w_xo": w_xo, "w_mlp1": w_mlp1,
            "w_mlp0": w_mlp0, "m64": m64, "segmat": segmat}
    wslab = np.zeros((W_ROWS, W_COLS), np.float32)
    for name, (r, c, o) in W_LAYOUT.items():
        wslab[:r, o:o + c] = np.asarray(mats[name])

    pslab = np.zeros((P_ROWS, P_COLS), np.float32)
    pslab[ROW_ROPE:ROW_ROPE + BT, 0:2 * D_LATENT] = np.tile(cos_head, (B, 2 * N_HEADS))
    pslab[ROW_ROPE:ROW_ROPE + BT, 2 * D_LATENT:4 * D_LATENT] = \
        np.tile(sin_head, (B, 2 * N_HEADS))
    bid = np.arange(BT) // T
    mask_bb = np.where(bid[:, None] == bid[None, :], 0.0, -1e30).astype(np.float32)
    pslab[ROW_MASK:ROW_MASK + BT, 0:HB] = np.tile(mask_bb, (1, N_HEADS))
    pslab[ROW_LN1, 0:D_LATENT] = np.asarray(ln1_w).reshape(-1)
    pslab[ROW_LN1, D_LATENT:2 * D_LATENT] = np.asarray(ln1_b).reshape(-1)
    pslab[ROW_XLN, 0:D_LATENT] = np.asarray(xln_w).reshape(-1)
    pslab[ROW_XLN, D_LATENT:2 * D_LATENT] = np.asarray(xln_b).reshape(-1)
    pslab[ROW_LN2, 0:D_LATENT] = np.asarray(ln2_w).reshape(-1)
    pslab[ROW_LN2, D_LATENT:2 * D_LATENT] = np.asarray(ln2_b).reshape(-1)
    pslab[ROW_BMLP1, 0:D_LATENT] = np.asarray(b_mlp1).reshape(-1)
    pslab[ROW_BMLP0, 0:D_FF] = np.asarray(b_mlp0).reshape(-1)

    # Weight slab in bf16 (halves DMA bytes; MXU default precision re-rounds to
    # bf16 anyway). Mask / RoPE tables / LN params stay f32 in pslab.
    return jnp.asarray(wslab, dtype=jnp.bfloat16), jnp.asarray(pslab)


def transformer_block(x, cond, noise_emb, wslab, pslab):
    x2d = x.reshape(BT, D_LATENT)
    cond2d = cond.reshape(BT, D_LATENT)
    out2d = pl.pallas_call(
        _transformer_block_kernel,
        out_shape=jax.ShapeDtypeStruct((BT, D_LATENT), jnp.float32),
    )(x2d, cond2d, noise_emb, wslab, pslab)
    return out2d.reshape(B, T, D_LATENT)


# ----------------------------------------------------------------------------
# Pure-JAX reference (HIGHEST precision ground truth, same math/conventions)
# ----------------------------------------------------------------------------
def _ref_ln(v, w, b):
    mu = jnp.mean(v, axis=-1, keepdims=True)
    var = jnp.mean((v - mu) ** 2, axis=-1, keepdims=True)
    return (v - mu) * jax.lax.rsqrt(var + LN_EPS) * w + b


def _ref_rope(v, cos, sin):   # v: (B, H, T, dh)
    rot = jnp.stack([-v[..., 1::2], v[..., 0::2]], axis=-1).reshape(v.shape)
    return v * cos + rot * sin


def _split_heads(v):          # (B, T, D) -> (B, H, T, dh)
    b, t, _ = v.shape
    return v.reshape(b, t, N_HEADS, D_HEAD).transpose(0, 2, 1, 3)


def _merge_heads(v):          # (B, H, T, dh) -> (B, T, D)
    b, h, t, dh = v.shape
    return v.transpose(0, 2, 1, 3).reshape(b, t, h * dh)


def _ref_attn(q, k, v):
    s = jnp.einsum('bhtd,bhsd->bhts', q, k, precision=REF_PREC) * ATTN_SCALE
    p = jax.nn.softmax(s, axis=-1)
    return jnp.einsum('bhts,bhsd->bhtd', p, v, precision=REF_PREC)


def transformer_block_ref(x, cond, noise_emb, params, cos, sin):
    (w_qkv, w_so, ln1_w, ln1_b, w_xkv, w_xq, w_xo, xln_w, xln_b,
     w_mlp0, b_mlp0, w_film, w_mlp1, b_mlp1, ln2_w, ln2_b) = params
    ein = lambda a, w: jnp.einsum('btd,df->btf', a, w, precision=REF_PREC)

    qkv = ein(x, w_qkv)
    q = _ref_rope(_split_heads(qkv[..., :D_LATENT]), cos, sin)
    k = _ref_rope(_split_heads(qkv[..., D_LATENT:2 * D_LATENT]), cos, sin)
    v = _split_heads(qkv[..., 2 * D_LATENT:])
    sattn = ein(_merge_heads(_ref_attn(q, k, v)), w_so)
    x1 = _ref_ln(x + sattn, ln1_w, ln1_b)

    kv = ein(cond, w_xkv)
    kx = _ref_rope(_split_heads(kv[..., :D_LATENT]), cos, sin)
    vx = _split_heads(kv[..., D_LATENT:])
    qx = _ref_rope(_split_heads(ein(x1, w_xq)), cos, sin)
    xattn = ein(_merge_heads(_ref_attn(qx, kx, vx)), w_xo)
    x2 = _ref_ln(x1 + xattn, xln_w, xln_b)

    h = ein(x2, w_mlp0) + b_mlp0
    h = jnp.maximum(h, 0.0)
    film = jnp.dot(noise_emb, w_film, precision=REF_PREC)       # (B, 2*D_FF)
    scale, shift = film[:, :D_FF], film[:, D_FF:]
    mu = jnp.mean(h, axis=-1, keepdims=True)
    var = jnp.mean((h - mu) ** 2, axis=-1, keepdims=True)
    h = (h - mu) * jax.lax.rsqrt(var + LN_EPS) * (1.0 + scale[:, None, :]) + shift[:, None, :]
    mlp_out = jnp.einsum('btf,fd->btd', h, w_mlp1, precision=REF_PREC) + b_mlp1
    return _ref_ln(x2 + mlp_out, ln2_w, ln2_b)


# ----------------------------------------------------------------------------
# Main
# ----------------------------------------------------------------------------
if __name__ == "__main__":
    keys = jax.random.split(jax.random.PRNGKey(0), 20)
    s = 0.05

    def w(k, *shape):
        return jax.random.normal(k, shape, jnp.float32) * s

    # All Linear weights stored pre-transposed as [d_in, d_out]; LayerNorm
    # params stored as (1, dim).
    w_qkv = w(keys[0], D_LATENT, 3 * D_LATENT)
    w_so = w(keys[1], D_LATENT, D_LATENT)
    ln1_w = 1.0 + w(keys[2], 1, D_LATENT)
    ln1_b = w(keys[3], 1, D_LATENT)
    w_xkv = w(keys[4], D_LATENT, 2 * D_LATENT)
    w_xq = w(keys[5], D_LATENT, D_LATENT)
    w_xo = w(keys[6], D_LATENT, D_LATENT)
    xln_w = 1.0 + w(keys[7], 1, D_LATENT)
    xln_b = w(keys[8], 1, D_LATENT)
    w_mlp0 = w(keys[9], D_LATENT, D_FF)
    b_mlp0 = w(keys[10], 1, D_FF)
    # The PyTorch module zero-inits mlp_film_cond_proj (zero_module); use
    # nonzero weights here so the FiLM path is actually exercised/validated.
    w_film = w(keys[18], D_NOISE, 2 * D_FF)
    w_mlp1 = w(keys[11], D_FF, D_LATENT)
    b_mlp1 = w(keys[12], 1, D_LATENT)
    ln2_w = 1.0 + w(keys[13], 1, D_LATENT)
    ln2_b = w(keys[14], 1, D_LATENT)

    params = (w_qkv, w_so, ln1_w, ln1_b, w_xkv, w_xq, w_xo, xln_w, xln_b,
              w_mlp0, b_mlp0, w_film, w_mlp1, b_mlp1, ln2_w, ln2_b)

    x = jax.random.normal(keys[15], (B, T, D_LATENT), jnp.float32)
    cond = jax.random.normal(keys[16], (B, T, D_LATENT), jnp.float32)
    noise_emb = jax.random.normal(keys[17], (B, D_NOISE), jnp.float32)

    cos_head, sin_head = make_rope_tables(T, D_HEAD)
    wslab, pslab = pack_inputs(params, cos_head, sin_head)

    out = transformer_block(x, cond, noise_emb, wslab, pslab)
    out = jax.block_until_ready(out)

    ref = transformer_block_ref(x, cond, noise_emb, params, cos_head, sin_head)
    # Kernel runs the MXU at default precision (bf16 passes, bf16 weight slab)
    # plus an approx softmax reciprocal vs. an f32 HIGHEST reference -> a few
    # 1e-3 absolute error on these O(1) post-LayerNorm outputs; 2e-2 bound.
    np.testing.assert_allclose(np.asarray(out), np.asarray(ref),
                               rtol=2e-2, atol=2e-2)

    print("KERNEL_OK")
</pallas_src>

<mosaic_0001>
module attributes {stable_mosaic.version = 11 : i64} {
  func.func @_transformer_block_kernel(%arg0: memref<16x32xf32, #tpu.memory_space<vmem>>, %arg1: memref<16x32xf32, #tpu.memory_space<vmem>>, %arg2: memref<2x16xf32, #tpu.memory_space<vmem>>, %arg3: memref<64x768xbf16, #tpu.memory_space<vmem>>, %arg4: memref<40x128xf32, #tpu.memory_space<vmem>>, %arg5: memref<16x32xf32, #tpu.memory_space<vmem>>) attributes {dimension_semantics = [], scalar_prefetch = 0 : i64, scratch_operands = 0 : i64, tpu.core_type = #tpu.core_type<tc>} {
    %c0 = arith.constant 0 : index
    %c0_0 = arith.constant 0 : index
    %0 = vector.load %arg0[%c0, %c0_0] : memref<16x32xf32, #tpu.memory_space<vmem>>, vector<16x32xf32>
    %c0_1 = arith.constant 0 : index
    %c0_2 = arith.constant 0 : index
    %1 = vector.load %arg1[%c0_1, %c0_2] : memref<16x32xf32, #tpu.memory_space<vmem>>, vector<16x32xf32>
    %c0_3 = arith.constant 0 : index
    %c0_4 = arith.constant 0 : index
    %2 = vector.load %arg2[%c0_3, %c0_4] : memref<2x16xf32, #tpu.memory_space<vmem>>, vector<2x16xf32>
    %c0_5 = arith.constant 0 : index
    %c0_6 = arith.constant 0 : index
    %3 = vector.load %arg4[%c0_5, %c0_6] : memref<40x128xf32, #tpu.memory_space<vmem>>, vector<16x64xf32>
    %c0_7 = arith.constant 0 : index
    %c64 = arith.constant 64 : index
    %4 = vector.load %arg4[%c0_7, %c64] : memref<40x128xf32, #tpu.memory_space<vmem>>, vector<16x64xf32>
    %c16 = arith.constant 16 : index
    %c0_8 = arith.constant 0 : index
    %5 = vector.load %arg4[%c16, %c0_8] : memref<40x128xf32, #tpu.memory_space<vmem>>, vector<16x64xf32>
    %c0_9 = arith.constant 0 : index
    %c256 = arith.constant 256 : index
    %6 = vector.load %arg3[%c0_9, %c256] : memref<64x768xbf16, #tpu.memory_space<vmem>>, vector<64x64xbf16>
    %7 = arith.extf %6 : vector<64x64xbf16> to vector<64x64xf32>
    %c0_10 = arith.constant 0 : index
    %c576 = arith.constant 576 : index
    %8 = vector.load %arg3[%c0_10, %c576] : memref<64x768xbf16, #tpu.memory_space<vmem>>, vector<64x32xbf16>
    %9 = arith.extf %8 : vector<64x32xbf16> to vector<64x32xf32>
    %c0_11 = arith.constant 0 : index
    %c640 = arith.constant 640 : index
    %10 = vector.load %arg3[%c0_11, %c640] : memref<64x768xbf16, #tpu.memory_space<vmem>>, vector<64x64xbf16>
    %11 = arith.extf %10 : vector<64x64xbf16> to vector<64x64xf32>
    %c0_12 = arith.constant 0 : index
    %c0_13 = arith.constant 0 : index
    %12 = vector.load %arg3[%c0_12, %c0_13] : memref<64x768xbf16, #tpu.memory_space<vmem>>, vector<32x96xbf16>
    %13 = arith.extf %12 : vector<32x96xbf16> to vector<32x96xf32>
    %cst = arith.constant dense<0.000000e+00> : vector<16x96xf32>
    %14 = tpu.matmul %0, %13, %cst {dimension_numbers = #tpu.dot_dimension_numbers<[1], [0], [0], [1], [0, 0, 1, 1], [], []>} : vector<16x32xf32>, vector<32x96xf32>, vector<16x96xf32> -> vector<16x96xf32>
    %15 = vector.extract_strided_slice %14 {offsets = [0, 0], sizes = [16, 64], strides = [1, 1]} : vector<16x96xf32> to vector<16x64xf32>
    %16 = arith.mulf %15, %3 : vector<16x64xf32>
    %cst_14 = arith.constant dense<0.000000e+00> : vector<16x64xf32>
    %17 = tpu.matmul %15, %7, %cst_14 {dimension_numbers = #tpu.dot_dimension_numbers<[1], [0], [0], [1], [0, 0, 1, 1], [], []>} : vector<16x64xf32>, vector<64x64xf32>, vector<16x64xf32> -> vector<16x64xf32>
    %18 = arith.mulf %17, %4 : vector<16x64xf32>
    %19 = arith.addf %16, %18 : vector<16x64xf32>
    %20 = vector.extract_strided_slice %19 {offsets = [0, 0], sizes = [16, 32], strides = [1, 1]} : vector<16x64xf32> to vector<16x32xf32>
    %21 = vector.extract_strided_slice %19 {offsets = [0, 32], sizes = [16, 32], strides = [1, 1]} : vector<16x64xf32> to vector<16x32xf32>
    %22 = vector.extract_strided_slice %14 {offsets = [0, 64], sizes = [16, 32], strides = [1, 1]} : vector<16x96xf32> to vector<16x32xf32>
    %c0_15 = arith.constant 0 : index
    %c96 = arith.constant 96 : index
    %23 = vector.load %arg3[%c0_15, %c96] : memref<64x768xbf16, #tpu.memory_space<vmem>>, vector<32x32xbf16>
    %24 = arith.extf %23 : vector<32x32xbf16> to vector<32x32xf32>
    %25 = tpu.concatenate %21, %21, %21, %21 in 0 : vector<16x32xf32>, vector<16x32xf32>, vector<16x32xf32>, vector<16x32xf32> -> vector<64x32xf32>
    %26 = arith.mulf %25, %9 : vector<64x32xf32>
    %27 = tpu.concatenate %22, %22, %22, %22 in 0 : vector<16x32xf32>, vector<16x32xf32>, vector<16x32xf32>, vector<16x32xf32> -> vector<64x32xf32>
    %28 = arith.mulf %27, %9 : vector<64x32xf32>
    %cst_16 = arith.constant dense<0.000000e+00> : vector<16x64xf32>
    %29 = tpu.matmul %20, %26, %cst_16 {dimension_numbers = #tpu.dot_dimension_numbers<[1], [1], [0], [0], [0, 0, 1, 0], [], []>} : vector<16x32xf32>, vector<64x32xf32>, vector<16x64xf32> -> vector<16x64xf32>
    %30 = arith.addf %29, %5 : vector<16x64xf32>
    %cst_17 = arith.constant dense<0xFF800000> : vector<16xf32>
    %31 = vector.multi_reduction <maximumf>, %30, %cst_17 [1] : vector<16x64xf32> to vector<16xf32>
    %32 = vector.shape_cast %31 : vector<16xf32> to vector<16x1xf32>
    %33 = vector.broadcast %32 : vector<16x1xf32> to vector<16x64xf32>
    %34 = arith.subf %30, %33 : vector<16x64xf32>
    %35 = math.exp %34 : vector<16x64xf32>
    %cst_18 = arith.constant dense<0.000000e+00> : vector<16x64xf32>
    %36 = tpu.matmul %35, %11, %cst_18 {dimension_numbers = #tpu.dot_dimension_numbers<[1], [0], [0], [1], [0, 0, 1, 1], [], []>} : vector<16x64xf32>, vector<64x64xf32>, vector<16x64xf32> -> vector<16x64xf32>
    %37 = tpu.reciprocal %36 {approx = true} : vector<16x64xf32> -> vector<16x64xf32>
    %38 = arith.mulf %35, %37 : vector<16x64xf32>
    %cst_19 = arith.constant dense<0.000000e+00> : vector<16x32xf32>
    %39 = tpu.matmul %38, %28, %cst_19 {dimension_numbers = #tpu.dot_dimension_numbers<[1], [0], [0], [1], [0, 0, 1, 1], [], []>} : vector<16x64xf32>, vector<64x32xf32>, vector<16x32xf32> -> vector<16x32xf32>
    %cst_20 = arith.constant dense<0.000000e+00> : vector<16x32xf32>
    %40 = tpu.matmul %39, %24, %cst_20 {dimension_numbers = #tpu.dot_dimension_numbers<[1], [0], [0], [1], [0, 0, 1, 1], [], []>} : vector<16x32xf32>, vector<32x32xf32>, vector<16x32xf32> -> vector<16x32xf32>
    %41 = arith.addf %0, %40 : vector<16x32xf32>
    %c32 = arith.constant 32 : index
    %c0_21 = arith.constant 0 : index
    %42 = vector.load %arg4[%c32, %c0_21] : memref<40x128xf32, #tpu.memory_space<vmem>>, vector<1x32xf32>
    %c32_22 = arith.constant 32 : index
    %c32_23 = arith.constant 32 : index
    %43 = vector.load %arg4[%c32_22, %c32_23] : memref<40x128xf32, #tpu.memory_space<vmem>>, vector<1x32xf32>
    %cst_24 = arith.constant dense<0.000000e+00> : vector<16xf32>
    %44 = vector.multi_reduction <add>, %41, %cst_24 [1] : vector<16x32xf32> to vector<16xf32>
    %45 = vector.shape_cast %44 : vector<16xf32> to vector<16x1xf32>
    %cst_25 = arith.constant 3.200000e+01 : f32
    %46 = vector.broadcast %cst_25 : f32 to vector<16x1xf32>
    %47 = arith.divf %45, %46 : vector<16x1xf32>
    %48 = vector.broadcast %47 : vector<16x1xf32> to vector<16x32xf32>
    %49 = arith.subf %41, %48 : vector<16x32xf32>
    %50 = arith.mulf %49, %49 : vector<16x32xf32>
    %cst_26 = arith.constant dense<0.000000e+00> : vector<16xf32>
    %51 = vector.multi_reduction <add>, %50, %cst_26 [1] : vector<16x32xf32> to vector<16xf32>
    %52 = vector.shape_cast %51 : vector<16xf32> to vector<16x1xf32>
    %cst_27 = arith.constant 3.200000e+01 : f32
    %53 = vector.broadcast %cst_27 : f32 to vector<16x1xf32>
    %54 = arith.divf %52, %53 : vector<16x1xf32>
    %cst_28 = arith.constant 9.99999974E-6 : f32
    %55 = vector.broadcast %cst_28 : f32 to vector<16x1xf32>
    %56 = arith.addf %54, %55 : vector<16x1xf32>
    %57 = math.rsqrt %56 : vector<16x1xf32>
    %58 = vector.broadcast %57 : vector<16x1xf32> to vector<16x32xf32>
    %59 = arith.mulf %49, %58 : vector<16x32xf32>
    %60 = vector.broadcast %42 : vector<1x32xf32> to vector<16x32xf32>
    %61 = arith.mulf %59, %60 : vector<16x32xf32>
    %62 = vector.broadcast %43 : vector<1x32xf32> to vector<16x32xf32>
    %63 = arith.addf %61, %62 : vector<16x32xf32>
    %c0_29 = arith.constant 0 : index
    %c320 = arith.constant 320 : index
    %64 = vector.load %arg3[%c0_29, %c320] : memref<64x768xbf16, #tpu.memory_space<vmem>>, vector<32x64xbf16>
    %65 = arith.extf %64 : vector<32x64xbf16> to vector<32x64xf32>
    %cst_30 = arith.constant dense<0.000000e+00> : vector<16x64xf32>
    %66 = tpu.matmul %1, %65, %cst_30 {dimension_numbers = #tpu.dot_dimension_numbers<[1], [0], [0], [1], [0, 0, 1, 1], [], []>} : vector<16x32xf32>, vector<32x64xf32>, vector<16x64xf32> -> vector<16x64xf32>
    %c0_31 = arith.constant 0 : index
    %c384 = arith.constant 384 : index
    %67 = vector.load %arg3[%c0_31, %c384] : memref<64x768xbf16, #tpu.memory_space<vmem>>, vector<32x32xbf16>
    %68 = arith.extf %67 : vector<32x32xbf16> to vector<32x32xf32>
    %cst_32 = arith.constant dense<0.000000e+00> : vector<16x32xf32>
    %69 = tpu.matmul %63, %68, %cst_32 {dimension_numbers = #tpu.dot_dimension_numbers<[1], [0], [0], [1], [0, 0, 1, 1], [], []>} : vector<16x32xf32>, vector<32x32xf32>, vector<16x32xf32> -> vector<16x32xf32>
    %70 = vector.extract_strided_slice %66 {offsets = [0, 0], sizes = [16, 32], strides = [1, 1]} : vector<16x64xf32> to vector<16x32xf32>
    %71 = tpu.concatenate %69, %70 in 1 : vector<16x32xf32>, vector<16x32xf32> -> vector<16x64xf32>
    %72 = arith.mulf %71, %3 : vector<16x64xf32>
    %cst_33 = arith.constant dense<0.000000e+00> : vector<16x64xf32>
    %73 = tpu.matmul %71, %7, %cst_33 {dimension_numbers = #tpu.dot_dimension_numbers<[1], [0], [0], [1], [0, 0, 1, 1], [], []>} : vector<16x64xf32>, vector<64x64xf32>, vector<16x64xf32> -> vector<16x64xf32>
    %74 = arith.mulf %73, %4 : vector<16x64xf32>
    %75 = arith.addf %72, %74 : vector<16x64xf32>
    %76 = vector.extract_strided_slice %75 {offsets = [0, 0], sizes = [16, 32], strides = [1, 1]} : vector<16x64xf32> to vector<16x32xf32>
    %77 = vector.extract_strided_slice %75 {offsets = [0, 32], sizes = [16, 32], strides = [1, 1]} : vector<16x64xf32> to vector<16x32xf32>
    %78 = vector.extract_strided_slice %66 {offsets = [0, 32], sizes = [16, 32], strides = [1, 1]} : vector<16x64xf32> to vector<16x32xf32>
    %c0_34 = arith.constant 0 : index
    %c416 = arith.constant 416 : index
    %79 = vector.load %arg3[%c0_34, %c416] : memref<64x768xbf16, #tpu.memory_space<vmem>>, vector<32x32xbf16>
    %80 = arith.extf %79 : vector<32x32xbf16> to vector<32x32xf32>
    %81 = tpu.concatenate %77, %77, %77, %77 in 0 : vector<16x32xf32>, vector<16x32xf32>, vector<16x32xf32>, vector<16x32xf32> -> vector<64x32xf32>
    %82 = arith.mulf %81, %9 : vector<64x32xf32>
    %83 = tpu.concatenate %78, %78, %78, %78 in 0 : vector<16x32xf32>, vector<16x32xf32>, vector<16x32xf32>, vector<16x32xf32> -> vector<64x32xf32>
    %84 = arith.mulf %83, %9 : vector<64x32xf32>
    %cst_35 = arith.constant dense<0.000000e+00> : vector<16x64xf32>
    %85 = tpu.matmul %76, %82, %cst_35 {dimension_numbers = #tpu.dot_dimension_numbers<[1], [1], [0], [0], [0, 0, 1, 0], [], []>} : vector<16x32xf32>, vector<64x32xf32>, vector<16x64xf32> -> vector<16x64xf32>
    %86 = arith.addf %85, %5 : vector<16x64xf32>
    %cst_36 = arith.constant dense<0xFF800000> : vector<16xf32>
    %87 = vector.multi_reduction <maximumf>, %86, %cst_36 [1] : vector<16x64xf32> to vector<16xf32>
    %88 = vector.shape_cast %87 : vector<16xf32> to vector<16x1xf32>
    %89 = vector.broadcast %88 : vector<16x1xf32> to vector<16x64xf32>
    %90 = arith.subf %86, %89 : vector<16x64xf32>
    %91 = math.exp %90 : vector<16x64xf32>
    %cst_37 = arith.constant dense<0.000000e+00> : vector<16x64xf32>
    %92 = tpu.matmul %91, %11, %cst_37 {dimension_numbers = #tpu.dot_dimension_numbers<[1], [0], [0], [1], [0, 0, 1, 1], [], []>} : vector<16x64xf32>, vector<64x64xf32>, vector<16x64xf32> -> vector<16x64xf32>
    %93 = tpu.reciprocal %92 {approx = true} : vector<16x64xf32> -> vector<16x64xf32>
    %94 = arith.mulf %91, %93 : vector<16x64xf32>
    %cst_38 = arith.constant dense<0.000000e+00> : vector<16x32xf32>
    %95 = tpu.matmul %94, %84, %cst_38 {dimension_numbers = #tpu.dot_dimension_numbers<[1], [0], [0], [1], [0, 0, 1, 1], [], []>} : vector<16x64xf32>, vector<64x32xf32>, vector<16x32xf32> -> vector<16x32xf32>
    %cst_39 = arith.constant dense<0.000000e+00> : vector<16x32xf32>
    %96 = tpu.matmul %95, %80, %cst_39 {dimension_numbers = #tpu.dot_dimension_numbers<[1], [0], [0], [1], [0, 0, 1, 1], [], []>} : vector<16x32xf32>, vector<32x32xf32>, vector<16x32xf32> -> vector<16x32xf32>
    %97 = arith.addf %63, %96 : vector<16x32xf32>
    %c33 = arith.constant 33 : index
    %c0_40 = arith.constant 0 : index
    %98 = vector.load %arg4[%c33, %c0_40] : memref<40x128xf32, #tpu.memory_space<vmem>>, vector<1x32xf32>
    %c33_41 = arith.constant 33 : index
    %c32_42 = arith.constant 32 : index
    %99 = vector.load %arg4[%c33_41, %c32_42] : memref<40x128xf32, #tpu.memory_space<vmem>>, vector<1x32xf32>
    %cst_43 = arith.constant dense<0.000000e+00> : vector<16xf32>
    %100 = vector.multi_reduction <add>, %97, %cst_43 [1] : vector<16x32xf32> to vector<16xf32>
    %101 = vector.shape_cast %100 : vector<16xf32> to vector<16x1xf32>
    %cst_44 = arith.constant 3.200000e+01 : f32
    %102 = vector.broadcast %cst_44 : f32 to vector<16x1xf32>
    %103 = arith.divf %101, %102 : vector<16x1xf32>
    %104 = vector.broadcast %103 : vector<16x1xf32> to vector<16x32xf32>
    %105 = arith.subf %97, %104 : vector<16x32xf32>
    %106 = arith.mulf %105, %105 : vector<16x32xf32>
    %cst_45 = arith.constant dense<0.000000e+00> : vector<16xf32>
    %107 = vector.multi_reduction <add>, %106, %cst_45 [1] : vector<16x32xf32> to vector<16xf32>
    %108 = vector.shape_cast %107 : vector<16xf32> to vector<16x1xf32>
    %cst_46 = arith.constant 3.200000e+01 : f32
    %109 = vector.broadcast %cst_46 : f32 to vector<16x1xf32>
    %110 = arith.divf %108, %109 : vector<16x1xf32>
    %cst_47 = arith.constant 9.99999974E-6 : f32
    %111 = vector.broadcast %cst_47 : f32 to vector<16x1xf32>
    %112 = arith.addf %110, %111 : vector<16x1xf32>
    %113 = math.rsqrt %112 : vector<16x1xf32>
    %114 = vector.broadcast %113 : vector<16x1xf32> to vector<16x32xf32>
    %115 = arith.mulf %105, %114 : vector<16x32xf32>
    %116 = vector.broadcast %98 : vector<1x32xf32> to vector<16x32xf32>
    %117 = arith.mulf %115, %116 : vector<16x32xf32>
    %118 = vector.broadcast %99 : vector<1x32xf32> to vector<16x32xf32>
    %119 = arith.addf %117, %118 : vector<16x32xf32>
    %c0_48 = arith.constant 0 : index
    %c512 = arith.constant 512 : index
    %120 = vector.load %arg3[%c0_48, %c512] : memref<64x768xbf16, #tpu.memory_space<vmem>>, vector<32x64xbf16>
    %121 = arith.extf %120 : vector<32x64xbf16> to vector<32x64xf32>
    %cst_49 = arith.constant dense<0.000000e+00> : vector<16x64xf32>
    %122 = tpu.matmul %119, %121, %cst_49 {dimension_numbers = #tpu.dot_dimension_numbers<[1], [0], [0], [1], [0, 0, 1, 1], [], []>} : vector<16x32xf32>, vector<32x64xf32>, vector<16x64xf32> -> vector<16x64xf32>
    %c36 = arith.constant 36 : index
    %c0_50 = arith.constant 0 : index
    %123 = vector.load %arg4[%c36, %c0_50] : memref<40x128xf32, #tpu.memory_space<vmem>>, vector<1x64xf32>
    %124 = vector.broadcast %123 : vector<1x64xf32> to vector<16x64xf32>
    %125 = arith.addf %122, %124 : vector<16x64xf32>
    %cst_51 = arith.constant 0.000000e+00 : f32
    %126 = vector.broadcast %cst_51 : f32 to vector<16x64xf32>
    %127 = arith.maximumf %125, %126 : vector<16x64xf32>
    %c0_52 = arith.constant 0 : index
    %c128 = arith.constant 128 : index
    %128 = vector.load %arg3[%c0_52, %c128] : memref<64x768xbf16, #tpu.memory_space<vmem>>, vector<16x128xbf16>
    %129 = arith.extf %128 : vector<16x128xbf16> to vector<16x128xf32>
    %cst_53 = arith.constant dense<0.000000e+00> : vector<2x128xf32>
    %130 = tpu.matmul %2, %129, %cst_53 {dimension_numbers = #tpu.dot_dimension_numbers<[1], [0], [0], [1], [0, 0, 1, 1], [], []>} : vector<2x16xf32>, vector<16x128xf32>, vector<2x128xf32> -> vector<2x128xf32>
    %131 = vector.extract_strided_slice %130 {offsets = [0, 0], sizes = [1, 128], strides = [1, 1]} : vector<2x128xf32> to vector<1x128xf32>
    %132 = vector.shape_cast %131 : vector<1x128xf32> to vector<1x128xf32>
    %133 = vector.broadcast %132 : vector<1x128xf32> to vector<8x128xf32>
    %134 = vector.extract_strided_slice %130 {offsets = [1, 0], sizes = [1, 128], strides = [1, 1]} : vector<2x128xf32> to vector<1x128xf32>
    %135 = vector.shape_cast %134 : vector<1x128xf32> to vector<1x128xf32>
    %136 = vector.broadcast %135 : vector<1x128xf32> to vector<8x128xf32>
    %137 = tpu.concatenate %133, %136 in 0 : vector<8x128xf32>, vector<8x128xf32> -> vector<16x128xf32>
    %138 = vector.extract_strided_slice %137 {offsets = [0, 0], sizes = [16, 64], strides = [1, 1]} : vector<16x128xf32> to vector<16x64xf32>
    %139 = vector.extract_strided_slice %137 {offsets = [0, 64], sizes = [16, 64], strides = [1, 1]} : vector<16x128xf32> to vector<16x64xf32>
    %cst_54 = arith.constant dense<0.000000e+00> : vector<16xf32>
    %140 = vector.multi_reduction <add>, %127, %cst_54 [1] : vector<16x64xf32> to vector<16xf32>
    %141 = vector.shape_cast %140 : vector<16xf32> to vector<16x1xf32>
    %cst_55 = arith.constant 6.400000e+01 : f32
    %142 = vector.broadcast %cst_55 : f32 to vector<16x1xf32>
    %143 = arith.divf %141, %142 : vector<16x1xf32>
    %144 = vector.broadcast %143 : vector<16x1xf32> to vector<16x64xf32>
    %145 = arith.subf %127, %144 : vector<16x64xf32>
    %146 = arith.mulf %145, %145 : vector<16x64xf32>
    %cst_56 = arith.constant dense<0.000000e+00> : vector<16xf32>
    %147 = vector.multi_reduction <add>, %146, %cst_56 [1] : vector<16x64xf32> to vector<16xf32>
    %148 = vector.shape_cast %147 : vector<16xf32> to vector<16x1xf32>
    %cst_57 = arith.constant 6.400000e+01 : f32
    %149 = vector.broadcast %cst_57 : f32 to vector<16x1xf32>
    %150 = arith.divf %148, %149 : vector<16x1xf32>
    %cst_58 = arith.constant 9.99999974E-6 : f32
    %151 = vector.broadcast %cst_58 : f32 to vector<16x1xf32>
    %152 = arith.addf %150, %151 : vector<16x1xf32>
    %153 = math.rsqrt %152 : vector<16x1xf32>
    %154 = vector.broadcast %153 : vector<16x1xf32> to vector<16x64xf32>
    %155 = arith.mulf %145, %154 : vector<16x64xf32>
    %cst_59 = arith.constant 1.000000e+00 : f32
    %156 = vector.broadcast %cst_59 : f32 to vector<16x64xf32>
    %157 = arith.addf %156, %138 : vector<16x64xf32>
    %158 = arith.mulf %155, %157 : vector<16x64xf32>
    %159 = arith.addf %158, %139 : vector<16x64xf32>
    %c0_60 = arith.constant 0 : index
    %c448 = arith.constant 448 : index
    %160 = vector.load %arg3[%c0_60, %c448] : memref<64x768xbf16, #tpu.memory_space<vmem>>, vector<64x32xbf16>
    %161 = arith.extf %160 : vector<64x32xbf16> to vector<64x32xf32>
    %cst_61 = arith.constant dense<0.000000e+00> : vector<16x32xf32>
    %162 = tpu.matmul %159, %161, %cst_61 {dimension_numbers = #tpu.dot_dimension_numbers<[1], [0], [0], [1], [0, 0, 1, 1], [], []>} : vector<16x64xf32>, vector<64x32xf32>, vector<16x32xf32> -> vector<16x32xf32>
    %c35 = arith.constant 35 : index
    %c0_62 = arith.constant 0 : index
    %163 = vector.load %arg4[%c35, %c0_62] : memref<40x128xf32, #tpu.memory_space<vmem>>, vector<1x32xf32>
    %164 = vector.broadcast %163 : vector<1x32xf32> to vector<16x32xf32>
    %165 = arith.addf %162, %164 : vector<16x32xf32>
    %166 = arith.addf %119, %165 : vector<16x32xf32>
    %c34 = arith.constant 34 : index
    %c0_63 = arith.constant 0 : index
    %167 = vector.load %arg4[%c34, %c0_63] : memref<40x128xf32, #tpu.memory_space<vmem>>, vector<1x32xf32>
    %c34_64 = arith.constant 34 : index
    %c32_65 = arith.constant 32 : index
    %168 = vector.load %arg4[%c34_64, %c32_65] : memref<40x128xf32, #tpu.memory_space<vmem>>, vector<1x32xf32>
    %cst_66 = arith.constant dense<0.000000e+00> : vector<16xf32>
    %169 = vector.multi_reduction <add>, %166, %cst_66 [1] : vector<16x32xf32> to vector<16xf32>
    %170 = vector.shape_cast %169 : vector<16xf32> to vector<16x1xf32>
    %cst_67 = arith.constant 3.200000e+01 : f32
    %171 = vector.broadcast %cst_67 : f32 to vector<16x1xf32>
    %172 = arith.divf %170, %171 : vector<16x1xf32>
    %173 = vector.broadcast %172 : vector<16x1xf32> to vector<16x32xf32>
    %174 = arith.subf %166, %173 : vector<16x32xf32>
    %175 = arith.mulf %174, %174 : vector<16x32xf32>
    %cst_68 = arith.constant dense<0.000000e+00> : vector<16xf32>
    %176 = vector.multi_reduction <add>, %175, %cst_68 [1] : vector<16x32xf32> to vector<16xf32>
    %177 = vector.shape_cast %176 : vector<16xf32> to vector<16x1xf32>
    %cst_69 = arith.constant 3.200000e+01 : f32
    %178 = vector.broadcast %cst_69 : f32 to vector<16x1xf32>
    %179 = arith.divf %177, %178 : vector<16x1xf32>
    %cst_70 = arith.constant 9.99999974E-6 : f32
    %180 = vector.broadcast %cst_70 : f32 to vector<16x1xf32>
    %181 = arith.addf %179, %180 : vector<16x1xf32>
    %182 = math.rsqrt %181 : vector<16x1xf32>
    %183 = vector.broadcast %182 : vector<16x1xf32> to vector<16x32xf32>
    %184 = arith.mulf %174, %183 : vector<16x32xf32>
    %185 = vector.broadcast %167 : vector<1x32xf32> to vector<16x32xf32>
    %186 = arith.mulf %184, %185 : vector<16x32xf32>
    %187 = vector.broadcast %168 : vector<1x32xf32> to vector<16x32xf32>
    %188 = arith.addf %186, %187 : vector<16x32xf32>
    %c0_71 = arith.constant 0 : index
    %c0_72 = arith.constant 0 : index
    %189 = vector.load %arg5[%c0_71, %c0_72] : memref<16x32xf32, #tpu.memory_space<vmem>>, vector<16x32xf32>
    tpu.vector_store %arg5[%c0_71, %c0_72], %188 {strides = array<i32>} : memref<16x32xf32, #tpu.memory_space<vmem>>, vector<16x32xf32>,
    return
  }
}

</mosaic_0001>

<bundles_post_ra>
// kernel: tpu_custom_call.1
= control target key start
LH: loop header
LB: loop body
LE: loop exit
PB: predicated region body
PF: predicated region fallthrough
CT: control target
= control target key end

     0   :  { %10 = vsyncpa [#allocation3], 0  ;;  %s3188_s0 = inlined_call_operand.hbm [shape: f32[16,32], index: 0, kind: input, shape index: {}]   ;;  %s3189_s1 = inlined_call_operand.hbm [shape: f32[16,32], index: 1, kind: input, shape index: {}]   ;;  %s3190_s2 = inlined_call_operand.vmem [shape: f32[2,16], index: 2, kind: input, shape index: {}]   ;;  %s3191_s3 = inlined_call_operand.hbm [shape: bf16[64,768], index: 3, kind: input, shape index: {}]   ;;  %s3192_s4 = inlined_call_operand.hbm [shape: f32[40,128], index: 4, kind: input, shape index: {}]   ;;  %s3193_s5 = inlined_call_operand.hbm [shape: f32[16,32], index: 5, kind: output, shape index: {}]  }
   0x1   :  { %11 = vsyncpa [#allocation6], 0 }
   0x2   :  { %12 = vsyncpa [#allocation9], 0 }
   0x3   :  { %13 = vsyncpa [#allocation4], 0  ;;  %s2626_s18 = smov [#allocation5]   ;;  %s2627_s20 = smov [#allocation2]  }
   0x4   :  { %s31_s19 = sshll.u32 %s2626_s18, 4  ;;  %s19_s21 = sshll.u32 %s2627_s20, 4  ;;  %s32_s19 = int_to_ptr.vmem [resolvable:$true] %s31_s19  ;;  %s20_s21 = int_to_ptr.vmem [resolvable:$true] %s19_s21 }
   0x5   :  { %s2526_s22 = scalar_lea.vmem %s32_s19, 256  ;;  %p2531_p1 = scmp.lt.s32.totalorder %s32_s19, %s32_s19 }
   0x6   :  { %p2527_p0 = scmp.ne.s32.totalorder %s32_s19, %s2526_s22  ;;  %p2532_p2 = scmp.lt.s32.totalorder %s2526_s22, %s2526_s22 }
   0x8   :  { %p2533_p3 = por %p2532_p2, %p2531_p1 }
   0xa   :  { %p2534_p4 = pnand %p2533_p3, %p2527_p0 }
   0xc   :  { %2537 = shalt.err (!%p2534_p4)
}
   0xd   :  { %s2628_s23 = smov 128   ;;  %s2629_s24 = smov 8  }
   0xe   :  { %37 = dma.hbm_to_vmem [thread:$0]  %s3189_s1, 256, %s32_s19, [#allocation6], %s2628_s23, %s2628_s23, %s2629_s24  }
   0xf   :  { %s2546_s27 = scalar_lea.vmem %s20_s21, 256  ;;  %p2551_p6 = scmp.lt.s32.totalorder %s20_s21, %s20_s21 }
  0x10   :  { %p2547_p5 = scmp.ne.s32.totalorder %s20_s21, %s2546_s27  ;;  %p2552_p7 = scmp.lt.s32.totalorder %s2546_s27, %s2546_s27 }
  0x12   :  { %p2553_p8 = por %p2552_p7, %p2551_p6 }
  0x14   :  { %p2554_p9 = pnand %p2553_p8, %p2547_p5 }
  0x16   :  { %2557 = shalt.err (!%p2554_p9)
}
  0x17   :  { %25 = dma.hbm_to_vmem [thread:$0]  %s3188_s0, 256, %s20_s21, [#allocation3], %s2628_s23, %s2628_s23, %s2629_s24  }
  0x18   :  { %s2630_s30 = smov [#allocation7]  }
  0x19   :  { %s45_s6 = sshll.u32 %s2630_s30, 4  ;;  %s46_s6 = int_to_ptr.vmem [resolvable:$true] %s45_s6 }
  0x1a   :  { %s2566_s7 = scalar_lea.vmem %s46_s6, 3072  ;;  %p2571_p11 = scmp.lt.s32.totalorder %s46_s6, %s46_s6 }
  0x1b   :  { %p2567_p10 = scmp.ne.s32.totalorder %s46_s6, %s2566_s7  ;;  %p2572_p12 = scmp.lt.s32.totalorder %s2566_s7, %s2566_s7 }
  0x1d   :  { %p2573_p13 = por %p2572_p12, %p2571_p11 }
  0x1f   :  { %p2574_p0 = pnand %p2573_p13, %p2567_p10 }
  0x21   :  { %2577 = shalt.err (!%p2574_p0)
}
  0x22   :  { %s2631_s1 = smov 384   ;;  %s2632_s8 = smov 24  }
  0x23   :  { %51 = dma.hbm_to_vmem [thread:$0]  %s3191_s3, 3072, %s46_s6, [#allocation6], %s2631_s1, %s2631_s1, %s2632_s8  }
  0x24   :  { %s2633_s11 = smov [#allocation8]  }
  0x25   :  { %s57_s12 = sshll.u32 %s2633_s11, 4  ;;  %s58_s12 = int_to_ptr.vmem [resolvable:$true] %s57_s12 }
  0x26   :  { %s2586_s0 = scalar_lea.vmem %s58_s12, 640  ;;  %p2591_p2 = scmp.lt.s32.totalorder %s58_s12, %s58_s12 }
  0x27   :  { %p2587_p1 = scmp.ne.s32.totalorder %s58_s12, %s2586_s0  ;;  %p2592_p3 = scmp.lt.s32.totalorder %s2586_s0, %s2586_s0 }
  0x29   :  { %p2593_p4 = por %p2592_p3, %p2591_p2 }
  0x2b   :  { %p2594_p5 = pnand %p2593_p4, %p2587_p1 }
  0x2d   :  { %2597 = shalt.err (!%p2594_p5)
}
  0x2e   :  { %63 = dma.hbm_to_vmem [thread:$0]  %s3192_s4, 640, %s58_s12, [#allocation9], %s2628_s23, %s2628_s23, %s2629_s24  }
  0x2f   :  { %2618 = dma.done.wait [#allocation3], 256  }
  0x30   :  { %2619 = vsyncadd [#allocation3], 4294967040 }
  0x31   :  { %2620 = dma.done.wait [#allocation6], 3328  }
  0x32   :  { %2621 = vsyncadd [#allocation6], 4294963968 }
  0x33   :  { %2622 = dma.done.wait [#allocation9], 640  }
  0x34   :  { %2623 = vsyncadd [#allocation9], 4294966656  ;;  %vm141_vm0 = vcmask 261120   ;;  %v136_v0 = vld [vmem:[#allocation7 + $0x30] ss:$24 sps:$4 sm:$0xff]   ;;  %v2691_v2 = vld [vmem:[#allocation2] sm:$0xff] }
  0x35   :  { %v134_v1 = vld [vmem:[#allocation7] ss:$24 sps:$4 sm:$0xff]   ;;  %v2693_v3 = vunpack.c.h.bf16 %v136_v0  ;;  %v2695_v4 = vunpack.c.l.bf16 %v136_v0  ;;  %2221 = vmatprep.mubr.msk.f32.mxu0 %vm141_vm0, %v2691_v2  ;;  %v2721_v14 = vld [vmem:[#allocation2 + $0x8] sm:$0xff]  ;;  %s2634_s3 = smov 64   ;;  %s2635_s4 = smov 96   ;;  %v2764_v27 = vld [vmem:[#allocation7 + $0x70] sm:$0xff]  }
  0x36   :  { %v92_v5 = vld [vmem:[#allocation7 + $0x98] ss:$24 sps:$4 sm:$0xff]   ;;  %v90_v6 = vld [vmem:[#allocation7 + $0x68] ss:$24 sps:$4 sm:$0xff]   ;;  %v2704_v9 = vunpack.c.h.bf16 %v134_v1  ;;  %v2711_v11 = vunpack.c.l.bf16 %v134_v1  ;;  %v113_v29 = vunpack.c.l.bf16 %v2764_v27  ;;  %vm225_vm1 = vcmask 523264   ;;  %s2636_s15 = smov 32  }
  0x37   :  { %v2699_v7 = vunpack.c.h.bf16 %v92_v5  ;;  %v2701_v8 = vunpack.c.l.bf16 %v92_v5  ;;  %2213 = vmatprep.subr.mxu0 %v2693_v3  ;;  %v2708_v10 = vunpack.c.h.bf16 %v90_v6  ;;  %v88_v12 = vld [vmem:[#allocation7 + $0x38] ss:$24 sps:$4 sm:$0xff]   ;;  %v2716_v13 = vunpack.c.l.bf16 %v90_v6  ;;  %v86_v17 = vld [vmem:[#allocation7 + $0x8] ss:$24 sps:$4 sm:$0xff]  }
  0x38   :  { %2214 = vmatpush3.msra.mxu0 %v2693_v3  ;;  %v2724_v15 = vunpack.c.h.bf16 %v88_v12  ;;  %v2730_v16 = vunpack.c.l.bf16 %v88_v12  ;;  %v2739_v18 = vunpack.c.h.bf16 %v86_v17  ;;  %v2742_v19 = vunpack.c.l.bf16 %v86_v17  ;;  %v2744_v20 = vld [vmem:[#allocation7 + $0xb8] sm:$0xff]   ;;  %v2750_v22 = vld [vmem:[#allocation8 + $0x8] sm:$0xff]  ;;  %v2752_v23 = vld [vmem:[#allocation7 + $0xa0] sm:$0xff]  }
  0x39   :  { %2224 = vmatprep.subr.mxu1 %v2699_v7  ;;  %2215 = vmatprep.subr.mxu0 %v2695_v4  ;;  %v116_v21 = vunpack.c.l.bf16 %v2744_v20  ;;  %v115_v24 = vunpack.c.l.bf16 %v2752_v23  ;;  %v2760_v25 = vld [vmem:[#allocation8] sm:$0xff]  ;;  %v2762_v26 = vld [vmem:[#allocation7 + $0x88] sm:$0xff]   ;;  %v2773_v30 = vld [vmem:[#allocation7 + $0x58] sm:$0xff]   ;;  %vm1713_vm2 = vcmask 130048   ;;  %vm2638_vm3 = vmmov 0  }
  0x3a   :  { %2225 = vmatpush3.msra.mxu1 %v2699_v7  ;;  %2216 = vmatpush3.msra.mxu0 %v2695_v4  ;;  %v114_v28 = vunpack.c.l.bf16 %v2762_v26  ;;  %v2775_v31 = vld [vmem:[#allocation7 + $0x40] sm:$0xff]   ;;  %v112_v32 = vunpack.c.l.bf16 %v2773_v30  ;;  %v2785_v34 = vld [vmem:[#allocation7 + $0x28] sm:$0xff]   ;;  %v2787_v35 = vld [vmem:[#allocation7 + $0x10] sm:$0xff]  }
  0x3b   :  { %2226 = vmatprep.subr.mxu1 %v2701_v8  ;;  %2217 = vmatprep.subr.mxu0 %v2704_v9  ;;  %v111_v33 = vunpack.c.l.bf16 %v2775_v31  ;;  %v110_v36 = vunpack.c.l.bf16 %v2785_v34  ;;  %v109_v37 = vunpack.c.l.bf16 %v2787_v35 }
  0x3c   :  { %2227 = vmatpush3.msra.mxu1 %v2701_v8  ;;  %2218 = vmatpush3.msra.mxu0 %v2704_v9 }
  0x3d   :  { %2228 = vmatprep.subr.mxu1 %v2708_v10  ;;  %2219 = vmatprep.subr.mxu0 %v2711_v11 }
  0x3e   :  { %2229 = vmatpush3.msra.mxu1 %v2708_v10  ;;  %2220 = vmatpush3.msra.mxu0 %v2711_v11 }
  0x3f   :  { %2230 = vmatprep.subr.mxu1 %v2716_v13  ;;  %2222 = vmatmul.mubr.msk.f32.vlgmr.msra.gmra.mxu0 %vm141_vm0, %v2721_v14 }
  0x40   :  { %2231 = vmatpush3.msra.mxu1 %v2716_v13  ;;  %311 = vrot.lane.b32.xlu0 %v2750_v22, %s2634_s3 }
  0x41   :  { %2232 = vmatprep.subr.mxu1 %v2724_v15  ;;  %341 = vrot.lane.b32.xlu1 %v116_v21, %s2635_s4 }
  0x42   :  { %2233 = vmatpush3.msra.mxu1 %v2724_v15 }
  0x43   :  { %2234 = vmatprep.subr.mxu1 %v2730_v16 }
  0x44   :  { %2235 = vmatpush3.msra.mxu1 %v2730_v16  ;;  %309 = vrot.lane.b32.xlu0 %v2760_v25, %s2634_s3 }
  0x45   :  { %2236 = vmatprep.subr.mxu1 %v2739_v18  ;;  %339 = vrot.lane.b32.xlu1 %v115_v24, %s2635_s4 }
  0x46   :  { %2237 = vmatpush3.msra.mxu1 %v2739_v18 }
  0x47   :  { %2238 = vmatprep.subr.mxu1 %v2742_v19 }
  0x48   :  { %2239 = vmatpush3.msra.mxu1 %v2742_v19  ;;  %337 = vrot.lane.b32.xlu0 %v114_v28, %s2635_s4 }
  0x49   :  { %335 = vrot.lane.b32.xlu1 %v113_v29, %s2635_s4 }
  0x4c   :  { %333 = vrot.lane.b32.xlu0 %v112_v32, %s2635_s4 }
  0x4d   :  { %331 = vrot.lane.b32.xlu1 %v111_v33, %s2635_s4 }
  0x50   :  { %329 = vrot.lane.b32.xlu0 %v110_v36, %s2635_s4 }
  0x51   :  { %327 = vrot.lane.b32.xlu1 %v109_v37, %s2635_s4 }
  0xb2   :  { %v2811_v40 = vpop.permute.xlu0 %311 }
  0xb3   :  { %v2813_v41 = vpop.permute.xlu1 %341 }
  0xb6   :  { %v2815_v42 = vpop.permute.xlu0 %309 }
  0xb7   :  { %v2817_v43 = vpop.permute.xlu1 %339 }
  0xba   :  { %v2822_v47 = vpop.permute.xlu0 %337 }
  0xbb   :  { %v2827_v52 = vpop.permute.xlu1 %335 }
  0xbe   :  { %v2833_v56 = vpop.permute.xlu0 %333 }
  0xbf   :  { %v2837_v58 = vpop.permute.xlu1 %331 }
  0xc2   :  { %v2843_v61 = vpop.permute.xlu0 %329 }
  0xc3   :  { %v2847_v63 = vpop.permute.xlu1 %327 }
  0xff   :  { %v2803_v38 = vpop.f32.mrf.mxu0 }
 0x100   :  { %v224_v45 = vmul.f32 %v2803_v38, %v2750_v22 }
 0x101   :  { %v2805_v39 = vpop.f32.mrf.mxu0 }
 0x102   :  { %2240 = vmatprep.mubr.msk.f32.mxu1 %vm225_vm1, %v2805_v39  ;;  %v223_v49 = vmul.f32 %v2805_v39, %v2760_v25 }
 0x103   :  { %2241 = vmatmul.mubr.msk.f32.vlgmr.msra.gmra.mxu1 %vm225_vm1, %v2803_v38 }
 0x1c3   :  { %v2242_v44 = vpop.f32.mrf.mxu1 }
 0x1c4   :  { %v316_v46 = vmul.f32 %v2242_v44, %v2811_v40 }
 0x1c5   :  { %v298_v48 = vpop.f32.mrf.mxu1 }
 0x1c6   :  { %v318_v50 = vadd.f32 %v316_v46, %v224_v45  ;;  %v315_v51 = vmul.f32 %v2815_v42, %v298_v48 }
 0x1c8   :  { %v317_v53 = vadd.f32 %v315_v51, %v223_v49  ;;  %v358_v54 = vmul.f32 %v2813_v41, %v318_v50  ;;  %v356_v57 = vmul.f32 %v2822_v47, %v318_v50  ;;  %v354_v60 = vmul.f32 %v2833_v56, %v318_v50 }
 0x1c9   :  { %v352_v0 = vmul.f32 %v2843_v61, %v318_v50  ;;  %v2872_v49 = vunpack.c.h.bf16 %v2744_v20  ;;  %v2875_v51 = vunpack.c.h.bf16 %v2752_v23  ;;  %v361_v23 = vmul.f32 %v2805_v39, %v111_v33 }
 0x1ca   :  { %389 = vrot.lane.b32.xlu0 %v358_v54, %s2635_s4  ;;  %2259 = vmatprep.mubr.msk.f32.mxu0 %vm141_vm0, %v317_v53  ;;  %v357_v55 = vmul.f32 %v2817_v43, %v317_v53  ;;  %v355_v59 = vmul.f32 %v2827_v52, %v317_v53  ;;  %v353_v62 = vmul.f32 %v2837_v58, %v317_v53  ;;  %v2884_v54 = vunpack.c.h.bf16 %v2764_v27 }
 0x1cb   :  { %v351_v1 = vmul.f32 %v2847_v63, %v317_v53  ;;  %2262 = vmatprep.subr.mxu1 %v2872_v49  ;;  %v2879_v53 = vunpack.c.h.bf16 %v2762_v26  ;;  %v359_v27 = vmul.f32 %v2805_v39, %v109_v37  ;;  %v362_v20 = vmul.f32 %v2803_v38, %v112_v32 }
 0x1cc   :  { %387 = vrot.lane.b32.xlu1 %v357_v55, %s2635_s4  ;;  %2263 = vmatpush3.msra.mxu1 %v2872_v49  ;;  %v2896_v55 = vld [vmem:[#allocation8 + $0x18] sm:$0xff] }
 0x1cd   :  { %2264 = vmatprep.subr.mxu1 %v2875_v51 }
 0x1ce   :  { %385 = vrot.lane.b32.xlu0 %v356_v57, %s2635_s4  ;;  %2265 = vmatpush3.msra.mxu1 %v2875_v51 }
 0x1cf   :  { %2266 = vmatprep.subr.mxu1 %v2879_v53 }
 0x1d0   :  { %383 = vrot.lane.b32.xlu1 %v355_v59, %s2635_s4  ;;  %2267 = vmatpush3.msra.mxu1 %v2879_v53  ;;  %v2898_v59 = vld [vmem:[#allocation8 + $0x10] sm:$0xff] }
 0x1d1   :  { %2268 = vmatprep.subr.mxu1 %v2884_v54 }
 0x1d2   :  { %381 = vrot.lane.b32.xlu0 %v354_v60, %s2635_s4  ;;  %2269 = vmatpush3.msra.mxu1 %v2884_v54 }
 0x1d4   :  { %379 = vrot.lane.b32.xlu1 %v353_v62, %s2635_s4 }
 0x1d6   :  { %377 = vrot.lane.b32.xlu0 %v352_v0, %s2635_s4 }
 0x1d8   :  { %375 = vrot.lane.b32.xlu1 %v351_v1, %s2635_s4 }
 0x23c   :  { %v390_v5 = vpop.permute.xlu0 %389 }
 0x23d   :  { %2243 = vmatprep.subr.msk.mxu0 %vm141_vm0, %v390_v5 }
 0x23e   :  { %2244 = vmatpush3.xpose.msk.msra.mxu0 %vm141_vm0, %v390_v5  ;;  %v388_v6 = vpop.permute.xlu1 %387 }
 0x23f   :  { %2245 = vmatprep.subr.msk.mxu0 %vm141_vm0, %v388_v6 }
 0x240   :  { %v386_v12 = vpop.permute.xlu0 %385 }
 0x242   :  { %2246 = vmatpush3.xpose.msk.msra.mxu0 %vm141_vm0, %v388_v6  ;;  %v384_v17 = vpop.permute.xlu1 %383  ;;  %v2905_v6 = vunpack.c.h.bf16 %v2775_v31 }
 0x243   :  { %2247 = vmatprep.subr.msk.mxu0 %vm141_vm0, %v386_v12 }
 0x244   :  { %v382_v44 = vpop.permute.xlu0 %381 }
 0x246   :  { %2248 = vmatpush3.xpose.msk.msra.mxu0 %vm141_vm0, %v386_v12  ;;  %v380_v45 = vpop.permute.xlu1 %379  ;;  %v2909_v12 = vunpack.c.h.bf16 %v2785_v34 }
 0x247   :  { %2249 = vmatprep.subr.msk.mxu0 %vm141_vm0, %v384_v17 }
 0x248   :  { %v378_v46 = vpop.permute.xlu0 %377 }
 0x24a   :  { %2250 = vmatpush3.xpose.msk.msra.mxu0 %vm141_vm0, %v384_v17  ;;  %v376_v48 = vpop.permute.xlu1 %375  ;;  %v2914_v17 = vunpack.c.h.bf16 %v2787_v35 }
 0x24b   :  { %2251 = vmatprep.subr.msk.mxu0 %vm141_vm0, %v382_v44 }
 0x24e   :  { %2252 = vmatpush3.xpose.msk.msra.mxu0 %vm141_vm0, %v382_v44  ;;  %v365_v44 = vmul.f32 %v2805_v39, %v115_v24  ;;  %v364_v24 = vmul.f32 %v2803_v38, %v114_v28 }
 0x24f   :  { %2253 = vmatprep.subr.msk.mxu0 %vm141_vm0, %v380_v45 }
 0x252   :  { %2254 = vmatpush3.xpose.msk.msra.mxu0 %vm141_vm0, %v380_v45  ;;  %v363_v45 = vmul.f32 %v2805_v39, %v113_v29 }
 0x253   :  { %2255 = vmatprep.subr.msk.mxu0 %vm141_vm0, %v378_v46 }
 0x256   :  { %2256 = vmatpush3.xpose.msk.msra.mxu0 %vm141_vm0, %v378_v46  ;;  %v366_v46 = vmul.f32 %v2803_v38, %v116_v21  ;;  %v360_v21 = vmul.f32 %v2803_v38, %v110_v36 }
 0x257   :  { %2257 = vmatprep.subr.msk.mxu0 %vm141_vm0, %v376_v48 }
 0x25a   :  { %2258 = vmatpush3.xpose.msk.msra.mxu0 %vm141_vm0, %v376_v48 }
 0x25d   :  { %2260 = vmatmul.mubr.msk.f32.vlgmr.msra.gmra.mxu0 %vm141_vm0, %v318_v50  ;;  %v2889_v50 = vunpack.c.h.bf16 %v2773_v30 }
 0x25f   :  { %2270 = vmatprep.subr.mxu1 %v2889_v50 }
 0x260   :  { %2271 = vmatpush3.msra.mxu1 %v2889_v50 }
 0x261   :  { %2272 = vmatprep.subr.mxu1 %v2905_v6 }
 0x262   :  { %2273 = vmatpush3.msra.mxu1 %v2905_v6 }
 0x263   :  { %2274 = vmatprep.subr.mxu1 %v2909_v12 }
 0x264   :  { %2275 = vmatpush3.msra.mxu1 %v2909_v12 }
 0x265   :  { %2276 = vmatprep.subr.mxu1 %v2914_v17 }
 0x266   :  { %2277 = vmatpush3.msra.mxu1 %v2914_v17 }
 0x31d   :  { %v2261_v57 = vpop.f32.mrf.mxu0 }
 0x31e   :  { %v485_v60 = vadd.f32 %v2261_v57, %v2896_v55 }
 0x31f   :  { %v479_v62 = vpop.f32.mrf.mxu0 }
 0x320   :  { %v480_v0 = vadd.f32 %v479_v62, %v2898_v59  ;;  %v491_v1 = vsel %vm225_vm1, %v485_v60, -inf }
 0x321   :  { %492 = vmax.xlane.f32.xlu1 %v491_v1 }
 0x322   :  { %v488_v5 = vsel %vm225_vm1, %v480_v0, -inf }
 0x323   :  { %489 = vmax.xlane.f32.xlu0 %v488_v5 }
 0x332   :  { %605 = vrot.lane.b32.xlu1 %v365_v44, %s2634_s3 }
 0x336   :  { %601 = vrot.lane.b32.xlu1 %v363_v45, %s2634_s3 }
 0x339   :  { %607 = vrot.lane.b32.xlu0 %v366_v46, %s2634_s3 }
 0x33a   :  { %597 = vrot.lane.b32.xlu1 %v361_v23, %s2634_s3 }
 0x33d   :  { %603 = vrot.lane.b32.xlu0 %v364_v24, %s2634_s3 }
 0x33e   :  { %593 = vrot.lane.b32.xlu1 %v359_v27, %s2634_s3 }
 0x341   :  { %599 = vrot.lane.b32.xlu0 %v362_v20, %s2634_s3 }
 0x342   :  { %706 = vrot.lane.b32.xlu1 %v2695_v4, %s2636_s15 }
 0x345   :  { %595 = vrot.lane.b32.xlu0 %v360_v21, %s2634_s3 }
 0x346   :  { %702 = vrot.lane.b32.xlu1 %v2711_v11, %s2636_s15 }
 0x349   :  { %708 = vrot.lane.b32.xlu0 %v2693_v3, %s2636_s15 }
 0x34d   :  { %704 = vrot.lane.b32.xlu0 %v2704_v9, %s2636_s15 }
 0x3aa   :  { %v493_v26 = vpop.xlane.xlu1 %492 }
 0x3ab   :  { %v495_v28 = vsub.f32 %v485_v60, %v493_v26 }
 0x3ac   :  { %v490_v29 = vpop.xlane.xlu0 %489 }
 0x3ad   :  { %v494_v31 = vsub.f32 %v480_v0, %v490_v29  ;;  %v498_v33 = vmul.f32 1.442695, %v495_v28  ;;  %v839_v29 = vld [vmem:[#allocation7 + $0x38] sm:$0xff]  }
 0x3ae   :  { %v606_v30 = vpop.permute.xlu1 %605 }
 0x3af   :  { %v496_v35 = vmul.f32 1.442695, %v494_v31  ;;  %v843_v31 = vunpack.c.l.bf16 %v839_v29 }
 0x3b0   :  { %v608_v37 = vpop.permute.xlu0 %607 }
 0x3b1   :  { %2486 = vpow2.f32 %v496_v35  ;;  %2281 = vmatprep.subr.mxu1 %v608_v37  ;;  %v840_v35 = vld [vmem:[#allocation7 + $0x50] sm:$0xff]  }
 0x3b2   :  { %2488 = vpow2.f32 %v498_v33  ;;  %v602_v34 = vpop.permute.xlu1 %601  ;;  %v837_v33 = vld [vmem:[#allocation7 + $0x8] sm:$0xff]  }
 0x3b4   :  { %v604_v48 = vpop.permute.xlu0 %603 }
 0x3b6   :  { %v598_v38 = vpop.permute.xlu1 %597 }
 0x3b8   :  { %v600_v36 = vpop.permute.xlu0 %599 }
 0x3ba   :  { %v594_v60 = vpop.permute.xlu1 %593 }
 0x3bc   :  { %v596_v57 = vpop.permute.xlu0 %595 }
 0x3be   :  { %v2487_v32 = vpop.eup %2486  ;;  %v707_v5 = vpop.permute.xlu1 %706 }
 0x3bf   :  { %v2489_v39 = vpop.eup %2488  ;;  %2278 = vmatprep.mubr.msk.f32.mxu1 %vm225_vm1, %v2487_v32 }
 0x3c0   :  { %2279 = vmatmul.mubr.msk.f32.vlgmr.msra.gmra.mxu1 %vm225_vm1, %v2489_v39  ;;  %v709_v1 = vpop.permute.xlu0 %708 }
 0x3c1   :  { %2282 = vmatpush3.msra.mxu1 %v608_v37  ;;  %2300 = vmatprep.subr.mxu0 %v709_v1  ;;  %v841_v37 = vunpack.c.l.bf16 %v837_v33 }
 0x3c2   :  { %2283 = vmatprep.subr.mxu1 %v606_v30  ;;  %2301 = vmatpush3.msra.mxu0 %v709_v1  ;;  %v703_v44 = vpop.permute.xlu1 %702 }
 0x3c3   :  { %2284 = vmatpush3.msra.mxu1 %v606_v30  ;;  %2302 = vmatprep.subr.mxu0 %v707_v5  ;;  %v844_v30 = vunpack.c.l.bf16 %v840_v35 }
 0x3c4   :  { %2285 = vmatprep.subr.mxu1 %v604_v48  ;;  %2303 = vmatpush3.msra.mxu0 %v707_v5  ;;  %v705_v3 = vpop.permute.xlu0 %704 }
 0x3c5   :  { %2286 = vmatpush3.msra.mxu1 %v604_v48  ;;  %2304 = vmatprep.subr.mxu0 %v705_v3 }
 0x3c6   :  { %2287 = vmatprep.subr.mxu1 %v602_v34  ;;  %2305 = vmatpush3.msra.mxu0 %v705_v3 }
 0x3c7   :  { %2288 = vmatpush3.msra.mxu1 %v602_v34  ;;  %2306 = vmatprep.subr.mxu0 %v703_v44 }
 0x3c8   :  { %2289 = vmatprep.subr.mxu1 %v600_v36  ;;  %2307 = vmatpush3.msra.mxu0 %v703_v44 }
 0x3c9   :  { %2290 = vmatpush3.msra.mxu1 %v600_v36 }
 0x3ca   :  { %2291 = vmatprep.subr.mxu1 %v598_v38 }
 0x3cb   :  { %2292 = vmatpush3.msra.mxu1 %v598_v38 }
 0x3cc   :  { %2293 = vmatprep.subr.mxu1 %v596_v57 }
 0x3cd   :  { %2294 = vmatpush3.msra.mxu1 %v596_v57 }
 0x3ce   :  { %2295 = vmatprep.subr.mxu1 %v594_v60 }
 0x3cf   :  { %2296 = vmatpush3.msra.mxu1 %v594_v60 }
 0x480   :  { %v2280_v62 = vpop.f32.mrf.mxu1 }
 0x481   :  { %2490 = vrcp.f32 %v2280_v62 }
 0x482   :  { %v572_v0 = vpop.f32.mrf.mxu1 }
 0x483   :  { %2492 = vrcp.f32 %v572_v0 }
 0x48e   :  { %v2491_v4 = vpop.eup %2490 }
 0x48f   :  { %v584_v11 = vmul.f32 %v2491_v4, %v2489_v39 }
 0x490   :  { %v2493_v9 = vpop.eup %2492 }
 0x491   :  { %v583_v45 = vmul.f32 %v2493_v9, %v2487_v32  ;;  %v838_v32 = vld [vmem:[#allocation7 + $0x20] sm:$0xff]   ;;  %v79_v9 = vld [vmem:[#allocation5 + $0x8] sm:$0xff] }
 0x493   :  { %2297 = vmatprep.mubr.msk.f32.mxu1 %vm225_vm1, %v583_v45  ;;  %v2977_v45 = vunpack.c.h.bf16 %v840_v35 }
 0x494   :  { %2298 = vmatmul.mubr.msk.f32.vlgmr.msra.gmra.mxu1 %vm225_vm1, %v584_v11  ;;  %v2979_v11 = vunpack.c.h.bf16 %v839_v29 }
 0x554   :  { %v2299_v46 = vpop.f32.mrf.mxu1 }
 0x556   :  { %v689_v23 = vpop.f32.mrf.mxu1 }
 0x557   :  { %2308 = vmatprep.mubr.msk.f32.mxu0 %vm141_vm0, %v689_v23  ;;  %v2986_v23 = vunpack.c.h.bf16 %v838_v32 }
 0x558   :  { %2309 = vmatmul.mubr.msk.f32.vlgmr.msra.gmra.mxu0 %vm141_vm0, %v2299_v46  ;;  %v2052_v46 = vld [vmem:[#allocation8 + $0x20] ss:$0 sm:$0xff] }
 0x618   :  { %v2310_v24 = vpop.f32.mrf.mxu0 }
 0x619   :  { %v796_v27 = vadd.f32 %v2310_v24, %v2721_v14  ;;  %v78_v14 = vld [vmem:[#allocation5] sm:$0xff]  ;;  %v2989_v24 = vunpack.c.h.bf16 %v837_v33 }
 0x61a   :  { %v786_v20 = vpop.f32.mrf.mxu0  ;;  %2319 = vmatprep.mubr.msk.f32.mxu0 %vm141_vm0, %v78_v14 }
 0x61b   :  { %v795_v21 = vadd.f32 %v786_v20, %v2691_v2  ;;  %v801_v26 = vsel %vm141_vm0, %v796_v27, 0.0  ;;  %v842_v2 = vunpack.c.l.bf16 %v838_v32 }
 0x61c   :  { %802 = vadd.xlane.f32.xlu1 %v801_v26 }
 0x61d   :  { %v798_v28 = vsel %vm141_vm0, %v795_v21, 0.0 }
 0x61e   :  { %799 = vadd.xlane.f32.xlu0 %v798_v28 }
 0x62d   :  { %853 = vrot.lane.b32.xlu1 %v843_v31, %s2634_s3 }
 0x631   :  { %849 = vrot.lane.b32.xlu1 %v841_v37, %s2634_s3 }
 0x634   :  { %855 = vrot.lane.b32.xlu0 %v844_v30, %s2634_s3 }
 0x638   :  { %851 = vrot.lane.b32.xlu0 %v842_v2, %s2634_s3 }
 0x6a5   :  { %v803_v39 = vpop.xlane.xlu1 %802 }
 0x6a6   :  { %v806_v48 = vmul.f32 0.03125, %v803_v39 }
 0x6a7   :  { %v800_v34 = vpop.xlane.xlu0 %799 }
 0x6a8   :  { %v808_v36 = vsub.f32 %v796_v27, %v806_v48  ;;  %v805_v38 = vmul.f32 0.03125, %v800_v34 }
 0x6a9   :  { %v854_v57 = vpop.permute.xlu1 %853 }
 0x6aa   :  { %v807_v60 = vsub.f32 %v795_v21, %v805_v38  ;;  %v810_v62 = vmul.f32 %v808_v36, %v808_v36 }
 0x6ab   :  { %v856_v0 = vpop.permute.xlu0 %855 }
 0x6ac   :  { %2311 = vmatprep.subr.mxu0 %v856_v0  ;;  %v814_v1 = vsel %vm141_vm0, %v810_v62, 0.0  ;;  %v809_v5 = vmul.f32 %v807_v60, %v807_v60 }
 0x6ad   :  { %815 = vadd.xlane.f32.xlu1 %v814_v1  ;;  %2312 = vmatpush3.msra.mxu0 %v856_v0  ;;  %v850_v4 = vpop.permute.xlu1 %849 }
 0x6ae   :  { %2313 = vmatprep.subr.mxu0 %v854_v57  ;;  %v811_v3 = vsel %vm141_vm0, %v809_v5, 0.0 }
 0x6af   :  { %812 = vadd.xlane.f32.xlu0 %v811_v3  ;;  %2314 = vmatpush3.msra.mxu0 %v854_v57  ;;  %v852_v44 = vpop.permute.xlu0 %851 }
 0x6b0   :  { %2315 = vmatprep.subr.mxu0 %v852_v44 }
 0x6b1   :  { %2316 = vmatpush3.msra.mxu0 %v852_v44 }
 0x6b2   :  { %2317 = vmatprep.subr.mxu0 %v850_v4 }
 0x6b3   :  { %2318 = vmatpush3.msra.mxu0 %v850_v4 }
 0x6b4   :  { %2320 = vmatmul.mubr.msk.f32.vlgmr.msra.gmra.mxu0 %vm141_vm0, %v79_v9  ;;  %2322 = vmatprep.subr.mxu0 %v2977_v45 }
 0x6b5   :  { %2323 = vmatpush3.msra.mxu0 %v2977_v45 }
 0x6b6   :  { %2324 = vmatprep.subr.mxu0 %v2979_v11 }
 0x6b7   :  { %2325 = vmatpush3.msra.mxu0 %v2979_v11 }
 0x6b8   :  { %2326 = vmatprep.subr.mxu0 %v2986_v23 }
 0x6b9   :  { %2327 = vmatpush3.msra.mxu0 %v2986_v23 }
 0x6ba   :  { %2328 = vmatprep.subr.mxu0 %v2989_v24 }
 0x6bb   :  { %2329 = vmatpush3.msra.mxu0 %v2989_v24 }
 0x6bc   :  { %2333 = vmatprep.subr.mxu0 %v2699_v7 }
 0x6c5   :  { %832 = vrot.lane.b32.xlu0 %v2052_v46, %s2635_s4 }
 0x736   :  { %v816_v27 = vpop.xlane.xlu1 %815 }
 0x737   :  { %v818_v20 = vmul.f32 0.03125, %v816_v27 }
 0x738   :  { %v813_v21 = vpop.xlane.xlu0 %812 }
 0x739   :  { %v820_v26 = vadd.f32 1e-05, %v818_v20  ;;  %v817_v28 = vmul.f32 0.03125, %v813_v21 }
 0x73b   :  { %2494 = vrsqrt.f32 %v820_v26  ;;  %v819_v29 = vadd.f32 1e-05, %v817_v28 }
 0x73c   :  { %v833_v14 = vpop.permute.xlu0 %832 }
 0x73d   :  { %2496 = vrsqrt.f32 %v819_v29 }
 0x748   :  { %v2495_v31 = vpop.eup %2494 }
 0x749   :  { %v824_v35 = vmul.f32 %v2495_v31, %v808_v36 }
 0x74a   :  { %v2497_v33 = vpop.eup %2496 }
 0x74b   :  { %v823_v37 = vmul.f32 %v2497_v33, %v807_v60  ;;  %v830_v30 = vmul.f32 %v2052_v46, %v824_v35 }
 0x74d   :  { %v829_v32 = vmul.f32 %v2052_v46, %v823_v37  ;;  %v2997_v39 = vadd.f32 %v833_v14, %v830_v30 }
 0x74f   :  { %v2995_v2 = vadd.f32 %v833_v14, %v829_v32 }
 0x751   :  { %2330 = vmatprep.mubr.msk.f32.mxu0 %vm141_vm0, %v2995_v2 }
 0x752   :  { %2331 = vmatmul.mubr.msk.f32.vlgmr.msra.gmra.mxu0 %vm141_vm0, %v2997_v39 }
 0x753   :  { %2334 = vmatpush3.msra.mxu0 %v2699_v7 }
 0x754   :  { %2335 = vmatprep.subr.mxu0 %v2701_v8 }
 0x755   :  { %2336 = vmatpush3.msra.mxu0 %v2701_v8 }
 0x756   :  { %2337 = vmatprep.subr.mxu0 %v2708_v10 }
 0x757   :  { %2338 = vmatpush3.msra.mxu0 %v2708_v10 }
 0x758   :  { %2339 = vmatprep.subr.mxu0 %v2716_v13 }
 0x759   :  { %2340 = vmatpush3.msra.mxu0 %v2716_v13 }
 0x75a   :  { %2341 = vmatprep.subr.mxu0 %v2724_v15 }
 0x75b   :  { %2342 = vmatpush3.msra.mxu0 %v2724_v15 }
 0x75c   :  { %2343 = vmatprep.subr.mxu0 %v2730_v16 }
 0x75d   :  { %2344 = vmatpush3.msra.mxu0 %v2730_v16 }
 0x75e   :  { %2345 = vmatprep.subr.mxu0 %v2739_v18 }
 0x75f   :  { %2346 = vmatpush3.msra.mxu0 %v2739_v18 }
 0x760   :  { %2347 = vmatprep.subr.mxu0 %v2742_v19 }
 0x761   :  { %2348 = vmatpush3.msra.mxu0 %v2742_v19 }
 0x762   :  { %2371 = vmatprep.subr.mxu0 %v2872_v49 }
 0x774   :  { %v3019_v7 = vpop.f32.mrf.mxu0 }
 0x775   :  { %1035 = vrot.lane.b32.xlu0 %v3019_v7, %s2636_s15  ;;  %v1143_v28 = vmul.f32 %v3019_v7, %v2813_v41  ;;  %v1139_v29 = vmul.f32 %v3019_v7, %v2833_v56 }
 0x776   :  { %v3023_v8 = vpop.f32.mrf.mxu0 }
 0x777   :  { %1033 = vrot.lane.b32.xlu1 %v3023_v8, %s2636_s15  ;;  %v1142_v26 = vmul.f32 %v3023_v8, %v2817_v43 }
 0x7e7   :  { %v1036_v13 = vpop.permute.xlu0 %1035 }
 0x7e9   :  { %v1034_v15 = vpop.permute.xlu1 %1033 }
 0x812   :  { %v2332_v10 = vpop.f32.mrf.mxu0 }
 0x813   :  { %v1040_v19 = vsel %vm141_vm0, %v2332_v10, %v1036_v13 }
 0x814   :  { %v1022_v16 = vpop.f32.mrf.mxu0 }
 0x815   :  { %v1039_v18 = vsel %vm141_vm0, %v1022_v16, %v1034_v15 }
 0x816   :  { %2349 = vmatprep.mubr.msk.f32.mxu0 %vm225_vm1, %v1039_v18 }
 0x817   :  { %2350 = vmatmul.mubr.msk.f32.vlgmr.msra.gmra.mxu0 %vm225_vm1, %v1040_v19 }
 0x818   :  { %2372 = vmatpush3.msra.mxu0 %v2872_v49 }
 0x819   :  { %2373 = vmatprep.subr.mxu0 %v2875_v51 }
 0x81a   :  { %2374 = vmatpush3.msra.mxu0 %v2875_v51  ;;  %v1042_v51 = vmul.f32 %v1040_v19, %v2750_v22 }
 0x81b   :  { %2375 = vmatprep.subr.mxu0 %v2879_v53 }
 0x81c   :  { %2376 = vmatpush3.msra.mxu0 %v2879_v53 }
 0x81d   :  { %2377 = vmatprep.subr.mxu0 %v2884_v54 }
 0x81e   :  { %2378 = vmatpush3.msra.mxu0 %v2884_v54 }
 0x81f   :  { %2379 = vmatprep.subr.mxu0 %v2889_v50 }
 0x820   :  { %2380 = vmatpush3.msra.mxu0 %v2889_v50  ;;  %v1041_v50 = vmul.f32 %v1039_v18, %v2760_v25 }
 0x821   :  { %2381 = vmatprep.subr.mxu0 %v2905_v6 }
 0x822   :  { %2382 = vmatpush3.msra.mxu0 %v2905_v6 }
 0x823   :  { %2383 = vmatprep.subr.mxu0 %v2909_v12 }
 0x824   :  { %2384 = vmatpush3.msra.mxu0 %v2909_v12 }
 0x825   :  { %2385 = vmatprep.subr.mxu0 %v2914_v17 }
 0x826   :  { %2386 = vmatpush3.msra.mxu0 %v2914_v17 }
 0x8d7   :  { %v2351_v49 = vpop.f32.mrf.mxu0 }
 0x8d8   :  { %v1125_v53 = vmul.f32 %v2351_v49, %v2811_v40 }
 0x8d9   :  { %v1115_v54 = vpop.f32.mrf.mxu0 }
 0x8da   :  { %v1127_v48 = vadd.f32 %v1125_v53, %v1042_v51  ;;  %v1124_v34 = vmul.f32 %v1115_v54, %v2815_v42 }
 0x8dc   :  { %v1126_v6 = vadd.f32 %v1124_v34, %v1041_v50  ;;  %v1135_v36 = vmul.f32 %v1127_v48, %v2813_v41  ;;  %v1133_v22 = vmul.f32 %v1127_v48, %v2822_v47  ;;  %v1131_v40 = vmul.f32 %v1127_v48, %v2833_v56 }
 0x8dd   :  { %v1129_v17 = vmul.f32 %v1127_v48, %v2843_v61  ;;  %v1138_v41 = vmul.f32 %v3023_v8, %v2837_v58 }
 0x8de   :  { %2368 = vmatprep.mubr.msk.f32.mxu1 %vm141_vm0, %v1126_v6  ;;  %1166 = vrot.lane.b32.xlu1 %v1135_v36, %s2635_s4  ;;  %v1134_v12 = vmul.f32 %v1126_v6, %v2817_v43  ;;  %v1132_v25 = vmul.f32 %v1126_v6, %v2827_v52  ;;  %v1130_v42 = vmul.f32 %v1126_v6, %v2837_v58 }
 0x8df   :  { %v1128_v38 = vmul.f32 %v1126_v6, %v2847_v63  ;;  %v1137_v43 = vmul.f32 %v3019_v7, %v2843_v61 }
 0x8e0   :  { %1164 = vrot.lane.b32.xlu0 %v1134_v12, %s2635_s4 }
 0x8e2   :  { %1162 = vrot.lane.b32.xlu1 %v1133_v22, %s2635_s4 }
 0x8e4   :  { %1160 = vrot.lane.b32.xlu0 %v1132_v25, %s2635_s4 }
 0x8e6   :  { %1158 = vrot.lane.b32.xlu1 %v1131_v40, %s2635_s4 }
 0x8e8   :  { %1156 = vrot.lane.b32.xlu0 %v1130_v42, %s2635_s4 }
 0x8ea   :  { %1154 = vrot.lane.b32.xlu1 %v1129_v17, %s2635_s4 }
 0x8ec   :  { %1152 = vrot.lane.b32.xlu0 %v1128_v38, %s2635_s4 }
 0x950   :  { %v1167_v57 = vpop.permute.xlu1 %1166 }
 0x951   :  { %2352 = vmatprep.subr.msk.mxu1 %vm141_vm0, %v1167_v57 }
 0x952   :  { %v1165_v60 = vpop.permute.xlu0 %1164  ;;  %2353 = vmatpush3.xpose.msk.msra.mxu1 %vm141_vm0, %v1167_v57 }
 0x953   :  { %2354 = vmatprep.subr.msk.mxu1 %vm141_vm0, %v1165_v60 }
 0x954   :  { %v1163_v62 = vpop.permute.xlu1 %1162 }
 0x956   :  { %2355 = vmatpush3.xpose.msk.msra.mxu1 %vm141_vm0, %v1165_v60  ;;  %v1161_v0 = vpop.permute.xlu0 %1160 }
 0x957   :  { %2356 = vmatprep.subr.msk.mxu1 %vm141_vm0, %v1163_v62 }
 0x958   :  { %v1159_v1 = vpop.permute.xlu1 %1158 }
 0x95a   :  { %2357 = vmatpush3.xpose.msk.msra.mxu1 %vm141_vm0, %v1163_v62  ;;  %v1157_v5 = vpop.permute.xlu0 %1156 }
 0x95b   :  { %2358 = vmatprep.subr.msk.mxu1 %vm141_vm0, %v1161_v0 }
 0x95c   :  { %v1155_v3 = vpop.permute.xlu1 %1154 }
 0x95e   :  { %2359 = vmatpush3.xpose.msk.msra.mxu1 %vm141_vm0, %v1161_v0  ;;  %v1153_v44 = vpop.permute.xlu0 %1152  ;;  %v3134_v0 = vld [vmem:[#allocation7 + $0x3c] sm:$0xff]  }
 0x95f   :  { %2360 = vmatprep.subr.msk.mxu1 %vm141_vm0, %v1159_v1 }
 0x962   :  { %2361 = vmatpush3.xpose.msk.msra.mxu1 %vm141_vm0, %v1159_v1 }
 0x963   :  { %2362 = vmatprep.subr.msk.mxu1 %vm141_vm0, %v1157_v5 }
 0x966   :  { %2363 = vmatpush3.xpose.msk.msra.mxu1 %vm141_vm0, %v1157_v5  ;;  %v1619_v5 = vunpack.c.h.bf16 %v3134_v0 }
 0x967   :  { %2364 = vmatprep.subr.msk.mxu1 %vm141_vm0, %v1155_v3 }
 0x96a   :  { %2365 = vmatpush3.xpose.msk.msra.mxu1 %vm141_vm0, %v1155_v3  ;;  %v2075_v3 = vld [vmem:[#allocation8 + $0x21] ss:$0 sm:$0xff] }
 0x96b   :  { %2366 = vmatprep.subr.msk.mxu1 %vm141_vm0, %v1153_v44 }
 0x96e   :  { %2367 = vmatpush3.xpose.msk.msra.mxu1 %vm141_vm0, %v1153_v44  ;;  %v3139_v44 = vld [vmem:[#allocation7 + $0x24] sm:$0xff]  }
 0x971   :  { %2369 = vmatmul.mubr.msk.f32.vlgmr.msra.gmra.mxu1 %vm141_vm0, %v1127_v48 }
 0xa31   :  { %v2370_v4 = vpop.f32.mrf.mxu1 }
 0xa32   :  { %v1262_v9 = vadd.f32 %v2370_v4, %v2896_v55  ;;  %v1141_v55 = vmul.f32 %v3019_v7, %v2822_v47  ;;  %v1136_v47 = vmul.f32 %v3023_v8, %v2847_v63  ;;  %v1618_v4 = vunpack.c.h.bf16 %v3139_v44 }
 0xa33   :  { %v1256_v46 = vpop.f32.mrf.mxu1 }
 0xa34   :  { %v1257_v27 = vadd.f32 %v1256_v46, %v2898_v59  ;;  %v1268_v20 = vsel %vm225_vm1, %v1262_v9, -inf  ;;  %v1140_v59 = vmul.f32 %v3023_v8, %v2827_v52 }
 0xa35   :  { %1269 = vmax.xlane.f32.xlu0 %v1268_v20 }
 0xa36   :  { %v1265_v21 = vsel %vm225_vm1, %v1257_v27, -inf }
 0xa37   :  { %1266 = vmax.xlane.f32.xlu1 %v1265_v21 }
 0xa48   :  { %1382 = vrot.lane.b32.xlu1 %v1142_v26, %s2635_s4 }
 0xa4b   :  { %1384 = vrot.lane.b32.xlu0 %v1143_v28, %s2635_s4 }
 0xa4c   :  { %1380 = vrot.lane.b32.xlu1 %v1141_v55, %s2635_s4 }
 0xa4f   :  { %1378 = vrot.lane.b32.xlu0 %v1140_v59, %s2635_s4 }
 0xa50   :  { %1376 = vrot.lane.b32.xlu1 %v1139_v29, %s2635_s4 }
 0xa53   :  { %1374 = vrot.lane.b32.xlu0 %v1138_v41, %s2635_s4 }
 0xa54   :  { %1372 = vrot.lane.b32.xlu1 %v1137_v43, %s2635_s4 }
 0xa57   :  { %1370 = vrot.lane.b32.xlu0 %v1136_v47, %s2635_s4 }
 0xa58   :  { %1485 = vrot.lane.b32.xlu1 %v2977_v45, %s2635_s4 }
 0xa5b   :  { %1483 = vrot.lane.b32.xlu0 %v2979_v11, %s2635_s4 }
 0xa5c   :  { %1481 = vrot.lane.b32.xlu1 %v2986_v23, %s2635_s4 }
 0xa5f   :  { %1479 = vrot.lane.b32.xlu0 %v2989_v24, %s2635_s4 }
 0xabe   :  { %v1270_v52 = vpop.xlane.xlu0 %1269 }
 0xabf   :  { %v1272_v56 = vsub.f32 %v1262_v9, %v1270_v52  ;;  %v3142_v9 = vld [vmem:[#allocation7 + $0xc] sm:$0xff]  }
 0xac0   :  { %v1267_v58 = vpop.xlane.xlu1 %1266  ;;  %v1617_v46 = vunpack.c.h.bf16 %v3142_v9 }
 0xac1   :  { %v1271_v61 = vsub.f32 %v1257_v27, %v1267_v58  ;;  %v1275_v31 = vmul.f32 1.442695, %v1272_v56 }
 0xac2   :  { %v1385_v63 = vpop.permute.xlu0 %1384 }
 0xac3   :  { %v1273_v35 = vmul.f32 1.442695, %v1271_v61  ;;  %2390 = vmatprep.subr.mxu0 %v1385_v63 }
 0xac4   :  { %v1383_v45 = vpop.permute.xlu1 %1382 }
 0xac5   :  { %2498 = vpow2.f32 %v1273_v35  ;;  %v2637_v35 = vmov 0.0  }
 0xac6   :  { %2500 = vpow2.f32 %v1275_v31  ;;  %v1379_v23 = vpop.permute.xlu0 %1378  ;;  %v1710_v31 = vld [vmem:[#allocation7 + $0x4] ss:$24 sps:$4 sm:$0xff]  }
 0xac8   :  { %v1381_v11 = vpop.permute.xlu1 %1380 }
 0xaca   :  { %v1375_v30 = vpop.permute.xlu0 %1374 }
 0xacc   :  { %v1377_v24 = vpop.permute.xlu1 %1376 }
 0xace   :  { %v1371_v14 = vpop.permute.xlu0 %1370 }
 0xad0   :  { %v1373_v32 = vpop.permute.xlu1 %1372 }
 0xad2   :  { %v2499_v33 = vpop.eup %2498  ;;  %v1484_v8 = vpop.permute.xlu0 %1483 }
 0xad3   :  { %v2501_v37 = vpop.eup %2500  ;;  %2387 = vmatprep.mubr.msk.f32.mxu0 %vm225_vm1, %v2499_v33 }
 0xad4   :  { %2388 = vmatmul.mubr.msk.f32.vlgmr.msra.gmra.mxu0 %vm225_vm1, %v2501_v37  ;;  %v1486_v7 = vpop.permute.xlu1 %1485 }
 0xad5   :  { %2391 = vmatpush3.msra.mxu0 %v1385_v63  ;;  %2409 = vmatprep.subr.mxu1 %v1486_v7  ;;  %v1712_v63 = vunpack.c.h.bf16 %v1710_v31 }
 0xad6   :  { %2392 = vmatprep.subr.mxu0 %v1383_v45  ;;  %2410 = vmatpush3.msra.mxu1 %v1486_v7  ;;  %v1480_v13 = vpop.permute.xlu0 %1479 }
 0xad7   :  { %2393 = vmatpush3.msra.mxu0 %v1383_v45  ;;  %2411 = vmatprep.subr.mxu1 %v1484_v8  ;;  %v1711_v45 = vunpack.c.l.bf16 %v1710_v31 }
 0xad8   :  { %2394 = vmatprep.subr.mxu0 %v1381_v11  ;;  %2412 = vmatpush3.msra.mxu1 %v1484_v8  ;;  %v1482_v10 = vpop.permute.xlu1 %1481 }
 0xad9   :  { %2395 = vmatpush3.msra.mxu0 %v1381_v11  ;;  %2413 = vmatprep.subr.mxu1 %v1482_v10  ;;  %v2076_v11 = vld [vmem:[#allocation8 + $0x24] ss:$0 sm:$0xff] }
 0xada   :  { %2396 = vmatprep.subr.mxu0 %v1379_v23  ;;  %2414 = vmatpush3.msra.mxu1 %v1482_v10  ;;  %v1842_v10 = vld [vmem:[#allocation7 + $0x9c] ss:$24 sps:$4 sm:$0xff]  }
 0xadb   :  { %2397 = vmatpush3.msra.mxu0 %v1379_v23  ;;  %2415 = vmatprep.subr.mxu1 %v1480_v13 }
 0xadc   :  { %2398 = vmatprep.subr.mxu0 %v1377_v24  ;;  %2416 = vmatpush3.msra.mxu1 %v1480_v13  ;;  %v1850_v13 = vunpack.c.l.bf16 %v1842_v10 }
 0xadd   :  { %2399 = vmatpush3.msra.mxu0 %v1377_v24 }
 0xade   :  { %2400 = vmatprep.subr.mxu0 %v1375_v30 }
 0xadf   :  { %2401 = vmatpush3.msra.mxu0 %v1375_v30 }
 0xae0   :  { %2402 = vmatprep.subr.mxu0 %v1373_v32 }
 0xae1   :  { %2403 = vmatpush3.msra.mxu0 %v1373_v32 }
 0xae2   :  { %2404 = vmatprep.subr.mxu0 %v1371_v14 }
 0xae3   :  { %2405 = vmatpush3.msra.mxu0 %v1371_v14 }
 0xae4   :  { %2431 = vmatprep.subr.mxu0 %v2637_v35 }
 0xb94   :  { %v2389_v15 = vpop.f32.mrf.mxu0 }
 0xb95   :  { %2502 = vrcp.f32 %v2389_v15  ;;  %v1851_v15 = vunpack.c.h.bf16 %v1842_v10 }
 0xb96   :  { %v1349_v16 = vpop.f32.mrf.mxu0 }
 0xb97   :  { %2504 = vrcp.f32 %v1349_v16  ;;  %v2471_v16 = vpack.i.bf16 %v1850_v13, %v1851_v15 }
 0xba2   :  { %v2503_v18 = vpop.eup %2502 }
 0xba3   :  { %v1361_v51 = vmul.f32 %v2503_v18, %v2501_v37  ;;  %v1840_v18 = vld [vmem:[#allocation7 + $0x6c] ss:$24 sps:$4 sm:$0xff]  }
 0xba4   :  { %v2505_v19 = vpop.eup %2504 }
 0xba5   :  { %v1360_v49 = vmul.f32 %v2505_v19, %v2499_v33  ;;  %v80_v33 = vld [vmem:[%s3190_s2] sm:$0x3]  ;;  %v1848_v19 = vunpack.c.l.bf16 %v1840_v18  ;;  %s2639_s2 = smov [#allocation10]  }
 0xba6   :  { %s2018_s18 = sshll.u32 %s2639_s2, 4  ;;  %s2019_s18 = int_to_ptr.vmem [resolvable:$true] %s2018_s18 }
 0xba7   :  { %2406 = vmatprep.mubr.msk.f32.mxu0 %vm225_vm1, %v1360_v49  ;;  %v1849_v49 = vunpack.c.h.bf16 %v1840_v18  ;;  %s2598_s19 = scalar_lea.vmem %s2019_s18, 256  ;;  %p2603_p7 = scmp.lt.s32.totalorder %s2019_s18, %s2019_s18 }
 0xba8   :  { %2407 = vmatmul.mubr.msk.f32.vlgmr.msra.gmra.mxu0 %vm225_vm1, %v1361_v51  ;;  %v1846_v51 = vunpack.c.l.bf16 %v3134_v0  ;;  %p2599_p6 = scmp.ne.s32.totalorder %s2019_s18, %s2598_s19  ;;  %p2604_p8 = scmp.lt.s32.totalorder %s2598_s19, %s2598_s19 }
 0xba9   :  { %2432 = vmatpush3.msra.mxu0 %v1712_v63  ;;  %2435 = vmatprep.mubr.msk.f32.mxu0 %vm2638_vm3, %v2637_v35 }
 0xbaa   :  { %2433 = vmatprep.subr.mxu0 %v2637_v35  ;;  %p2605_p9 = por %p2604_p8, %p2603_p7 }
 0xbab   :  { %2434 = vmatpush3.msra.mxu0 %v1711_v45 }
 0xbac   :  { %2436 = vmatmul.mubr.msk.f32.vlgmr.msra.gmra.mxu0 %vm1713_vm2, %v80_v33  ;;  %p2606_p10 = pnand %p2605_p9, %p2599_p6 }
 0xc68   :  { %v2408_v53 = vpop.f32.mrf.mxu0 }
 0xc6a   :  { %v1466_v54 = vpop.f32.mrf.mxu0 }
 0xc6b   :  { %2417 = vmatprep.mubr.msk.f32.mxu1 %vm141_vm0, %v1466_v54  ;;  %v2476_v54 = vpack.i.bf16 %v1848_v19, %v1849_v49 }
 0xc6c   :  { %2418 = vmatmul.mubr.msk.f32.vlgmr.msra.gmra.mxu1 %vm141_vm0, %v2408_v53 }
 0xd2c   :  { %v2419_v50 = vpop.f32.mrf.mxu1 }
 0xd2d   :  { %v1573_v48 = vadd.f32 %v2419_v50, %v2997_v39 }
 0xd2e   :  { %v1563_v34 = vpop.f32.mrf.mxu1 }
 0xd2f   :  { %v1572_v6 = vadd.f32 %v1563_v34, %v2995_v2  ;;  %v1578_v36 = vsel %vm141_vm0, %v1573_v48, 0.0  ;;  %v3132_v2 = vld [vmem:[#allocation7 + $0x54] sm:$0xff]   ;;  %v1787_v34 = vlaneseq }
 0xd30   :  { %1579 = vadd.xlane.f32.xlu0 %v1578_v36  ;;  %v1620_v1 = vunpack.c.h.bf16 %v3132_v2  ;;  %v1847_v53 = vunpack.c.l.bf16 %v3132_v2 }
 0xd31   :  { %v1575_v12 = vsel %vm141_vm0, %v1572_v6, 0.0 }
 0xd32   :  { %1576 = vadd.xlane.f32.xlu1 %v1575_v12  ;;  %2420 = vmatprep.subr.mxu1 %v1620_v1  ;;  %v2481_v50 = vpack.i.bf16 %v1846_v51, %v1847_v53 }
 0xd33   :  { %2421 = vmatpush3.msra.mxu1 %v1620_v1 }
 0xd34   :  { %2422 = vmatprep.subr.mxu1 %v1619_v5 }
 0xd35   :  { %2423 = vmatpush3.msra.mxu1 %v1619_v5 }
 0xd36   :  { %2424 = vmatprep.subr.mxu1 %v1618_v4 }
 0xd37   :  { %2425 = vmatpush3.msra.mxu1 %v1618_v4 }
 0xd38   :  { %2426 = vmatprep.subr.mxu1 %v1617_v46 }
 0xd39   :  { %2427 = vmatpush3.msra.mxu1 %v1617_v46 }
 0xdb9   :  { %v1580_v22 = vpop.xlane.xlu0 %1579 }
 0xdba   :  { %v1582_v25 = vmul.f32 0.03125, %v1580_v22  ;;  %v1783_v22 = vpop.f32.mrf.mxu0 }
 0xdbb   :  { %v1577_v40 = vpop.xlane.xlu1 %1576 }
 0xdbc   :  { %v1584_v42 = vsub.f32 %v1573_v48, %v1582_v25  ;;  %v1581_v17 = vmul.f32 0.03125, %v1577_v40  ;;  %v1845_v48 = vunpack.c.l.bf16 %v3139_v44 }
 0xdbe   :  { %v1583_v38 = vsub.f32 %v1572_v6, %v1581_v17  ;;  %v1586_v57 = vmul.f32 %v1584_v42, %v1584_v42  ;;  %v1788_v6 = vshrl.u32 %v1787_v34, 7  ;;  %v1844_v17 = vunpack.c.l.bf16 %v3142_v9 }
 0xdc0   :  { %v1590_v60 = vsel %vm141_vm0, %v1586_v57, 0.0  ;;  %v1585_v62 = vmul.f32 %v1583_v38, %v1583_v38  ;;  %v1789_v36 = vsub.s32 0, %v1788_v6  ;;  %v1793_v12 = vsub.s32 1, %v1788_v6 }
 0xdc1   :  { %1591 = vadd.xlane.f32.xlu1 %v1590_v60 }
 0xdc2   :  { %v1587_v39 = vsel %vm141_vm0, %v1585_v62, 0.0  ;;  %v1790_v25 = vrot.slane %v1783_v22, %v1789_v36  ;;  %v1794_v40 = vrot.slane %v1783_v22, %v1793_v12  ;;  %v2083_v22 = vld [vmem:[#allocation8 + $0x22] ss:$0 sm:$0xff] }
 0xdc3   :  { %1588 = vadd.xlane.f32.xlu0 %v1587_v39 }
 0xdc4   :  { %v1823_v33 = vadd.f32 1.0, %v1794_v40 }
 0xdd9   :  { %1608 = vrot.lane.b32.xlu0 %v2075_v3, %s2635_s4 }
 0xddd   :  { %2477 = vrot.lane.b32.xlu0 %v2476_v54, %s2634_s3 }
 0xde1   :  { %2482 = vrot.lane.b32.xlu0 %v2481_v50, %s2634_s3 }
 0xde5   :  { %1867 = vrot.lane.b32.xlu0 %v1845_v48, %s2634_s3 }
 0xde9   :  { %1828 = vrot.lane.b32.xlu0 %v1790_v25, %s2634_s3 }
 0xded   :  { %1865 = vrot.lane.b32.xlu0 %v1844_v17, %s2634_s3 }
 0xe4a   :  { %v1592_v27 = vpop.xlane.xlu1 %1591 }
 0xe4b   :  { %v1594_v20 = vmul.f32 0.03125, %v1592_v27 }
 0xe4c   :  { %v1589_v21 = vpop.xlane.xlu0 %1588 }
 0xe4d   :  { %v1596_v26 = vadd.f32 1e-05, %v1594_v20  ;;  %v1593_v28 = vmul.f32 0.03125, %v1589_v21 }
 0xe4f   :  { %2506 = vrsqrt.f32 %v1596_v26  ;;  %v1595_v55 = vadd.f32 1e-05, %v1593_v28 }
 0xe50   :  { %v1609_v56 = vpop.permute.xlu0 %1608 }
 0xe51   :  { %2508 = vrsqrt.f32 %v1595_v55 }
 0xe54   :  { %v2478_v46 = vpop.permute.xlu0 %2477 }
 0xe55   :  { %v2480_v27 = vunpack.i.h.bf16 %v2478_v46  ;;  %v2479_v20 = vunpack.i.l.bf16 %v2478_v46 }
 0xe58   :  { %v2483_v21 = vpop.permute.xlu0 %2482 }
 0xe59   :  { %v2485_v26 = vunpack.i.h.bf16 %v2483_v21  ;;  %v2484_v28 = vunpack.i.l.bf16 %v2483_v21 }
 0xe5c   :  { %v2507_v59 = vpop.eup %2506  ;;  %v1868_v55 = vpop.permute.xlu0 %1867 }
 0xe5d   :  { %v1600_v29 = vmul.f32 %v2507_v59, %v1584_v42  ;;  %v2437_v42 = vpop.f32.mrf.mxu0 }
 0xe5e   :  { %v2509_v41 = vpop.eup %2508 }
 0xe5f   :  { %v1599_v43 = vmul.f32 %v2509_v41, %v1583_v38  ;;  %v1606_v47 = vmul.f32 %v2075_v3, %v1600_v29 }
 0xe60   :  { %v1829_v59 = vpop.permute.xlu0 %1828 }
 0xe61   :  { %v1605_v52 = vmul.f32 %v2075_v3, %v1599_v43  ;;  %v3147_v61 = vadd.f32 %v1609_v56, %v1606_v47 }
 0xe63   :  { %v3145_v58 = vadd.f32 %v1609_v56, %v1605_v52 }
 0xe64   :  { %v1866_v29 = vpop.permute.xlu0 %1865 }
 0xe65   :  { %2428 = vmatprep.mubr.msk.f32.mxu1 %vm141_vm0, %v3145_v58 }
 0xe66   :  { %2429 = vmatmul.mubr.msk.f32.vlgmr.msra.gmra.mxu1 %vm141_vm0, %v3147_v61 }
 0xf26   :  { %v2430_v37 = vpop.f32.mrf.mxu1 }
 0xf27   :  { %v1704_v24 = vadd.f32 %v2430_v37, %v2076_v11  ;;  %v1822_v37 = vadd.f32 1.0, %v1790_v25 }
 0xf28   :  { %v1698_v23 = vpop.f32.mrf.mxu1 }
 0xf29   :  { %v1699_v30 = vadd.f32 %v2076_v11, %v1698_v23  ;;  %v1708_v14 = vmax.f32 %v1704_v24, 0.0 }
 0xf2b   :  { %v1707_v32 = vmax.f32 %v1699_v30, 0.0  ;;  %v1798_v8 = vsel %vm225_vm1, %v1708_v14, 0.0 }
 0xf2d   :  { %v1795_v7 = vsel %vm225_vm1, %v1707_v32, 0.0 }
 0xf2e   :  { %1796 = vadd.xlane.f32.xlu1 %v1795_v7  ;;  %v2080_v7 = vld [vmem:[#allocation8 + $0x23] ss:$0 sm:$0xff] }
 0xf32   :  { %1799 = vadd.xlane.f32.xlu1 %v1798_v8 }
 0xf43   :  { %2472 = vrot.lane.b32.xlu1 %v2471_v16, %s2634_s3 }
 0xfb7   :  { %v1797_v38 = vpop.xlane.xlu1 %1796 }
 0xfb8   :  { %v1802_v57 = vmul.f32 0.015625, %v1797_v38 }
 0xfba   :  { %v1804_v39 = vsub.f32 %v1707_v32, %v1802_v57 }
 0xfbb   :  { %v1800_v60 = vpop.xlane.xlu1 %1799 }
 0xfbc   :  { %v1803_v62 = vmul.f32 0.015625, %v1800_v60  ;;  %v1806_v4 = vmul.f32 %v1804_v39, %v1804_v39 }
 0xfbe   :  { %v1805_v2 = vsub.f32 %v1708_v14, %v1803_v62  ;;  %v1808_v9 = vsel %vm225_vm1, %v1806_v4, 0.0 }
 0xfbf   :  { %v2473_v0 = vpop.permute.xlu1 %2472 }
 0xfc0   :  { %v1807_v1 = vmul.f32 %v1805_v2, %v1805_v2  ;;  %v2475_v5 = vunpack.i.h.bf16 %v2473_v0  ;;  %v2474_v3 = vunpack.i.l.bf16 %v2473_v0 }
 0xfc2   :  { %v1811_v44 = vsel %vm225_vm1, %v1807_v1, 0.0  ;;  %2438 = vmatprep.subr.mxu1 %v2474_v3 }
 0xfc3   :  { %1812 = vadd.xlane.f32.xlu1 %v1811_v44  ;;  %2439 = vmatpush3.msra.mxu1 %v2474_v3 }
 0xfc4   :  { %2440 = vmatprep.subr.mxu1 %v2475_v5 }
 0xfc5   :  { %2441 = vmatpush3.msra.mxu1 %v2475_v5 }
 0xfc6   :  { %2442 = vmatprep.subr.mxu1 %v2479_v20 }
 0xfc7   :  { %1809 = vadd.xlane.f32.xlu1 %v1808_v9  ;;  %2443 = vmatpush3.msra.mxu1 %v2479_v20 }
 0xfc8   :  { %2444 = vmatprep.subr.mxu1 %v2480_v27 }
 0xfc9   :  { %2445 = vmatpush3.msra.mxu1 %v2480_v27 }
 0xfca   :  { %2446 = vmatprep.subr.mxu1 %v2484_v28 }
 0xfcb   :  { %2447 = vmatpush3.msra.mxu1 %v2484_v28 }
 0xfcc   :  { %2448 = vmatprep.subr.mxu1 %v2485_v26 }
 0xfcd   :  { %2449 = vmatpush3.msra.mxu1 %v2485_v26 }
 0xfce   :  { %2450 = vmatprep.subr.mxu1 %v1868_v55 }
 0xfcf   :  { %2451 = vmatpush3.msra.mxu1 %v1868_v55 }
 0xfd0   :  { %2452 = vmatprep.subr.mxu1 %v1866_v29 }
 0xfd1   :  { %2453 = vmatpush3.msra.mxu1 %v1866_v29 }
 0xfd8   :  { %1830 = vrot.lane.b32.xlu1 %v1794_v40, %s2634_s3 }
0x104c   :  { %v1813_v41 = vpop.xlane.xlu1 %1812 }
0x104d   :  { %v1815_v43 = vmul.f32 0.015625, %v1813_v41 }
0x104f   :  { %v1817_v47 = vadd.f32 1e-05, %v1815_v43 }
0x1050   :  { %v1810_v52 = vpop.xlane.xlu1 %1809 }
0x1051   :  { %2510 = vrsqrt.f32 %v1817_v47  ;;  %v1814_v56 = vmul.f32 0.015625, %v1810_v52 }
0x1053   :  { %v1816_v31 = vadd.f32 1e-05, %v1814_v56 }
0x1054   :  { %v1831_v30 = vpop.permute.xlu1 %1830 }
0x1055   :  { %2512 = vrsqrt.f32 %v1816_v31 }
0x105e   :  { %v2511_v63 = vpop.eup %2510 }
0x105f   :  { %v1821_v35 = vmul.f32 %v2511_v63, %v1805_v2 }
0x1061   :  { %v1825_v23 = vmul.f32 %v1823_v33, %v1821_v35 }
0x1062   :  { %v2513_v45 = vpop.eup %2512 }
0x1063   :  { %v1820_v11 = vmul.f32 %v2513_v45, %v1804_v39  ;;  %v1835_v14 = vadd.f32 %v1831_v30, %v1825_v23 }
0x1065   :  { %v1824_v24 = vmul.f32 %v1822_v37, %v1820_v11 }
0x1067   :  { %v1834_v32 = vadd.f32 %v1829_v59, %v1824_v24 }
0x1069   :  { %2454 = vmatprep.mubr.msk.f32.mxu1 %vm225_vm1, %v1834_v32 }
0x106a   :  { %2455 = vmatmul.mubr.msk.f32.vlgmr.msra.gmra.mxu1 %vm225_vm1, %v1835_v14 }
0x112a   :  { %v2456_v8 = vpop.f32.mrf.mxu1 }
0x112b   :  { %v1967_v10 = vadd.f32 %v2456_v8, %v2080_v7 }
0x112c   :  { %v1961_v13 = vpop.f32.mrf.mxu1 }
0x112d   :  { %v1962_v15 = vadd.f32 %v2080_v7, %v1961_v13  ;;  %v1971_v16 = vadd.f32 %v1967_v10, %v3147_v61 }
0x112f   :  { %v1976_v18 = vsel %vm141_vm0, %v1971_v16, 0.0  ;;  %v1970_v19 = vadd.f32 %v1962_v15, %v3145_v58 }
0x1130   :  { %1977 = vadd.xlane.f32.xlu0 %v1976_v18 }
0x1131   :  { %v1973_v49 = vsel %vm141_vm0, %v1970_v19, 0.0 }
0x1132   :  { %1974 = vadd.xlane.f32.xlu1 %v1973_v49 }
0x11b9   :  { %v1978_v51 = vpop.xlane.xlu0 %1977 }
0x11ba   :  { %v1980_v53 = vmul.f32 0.03125, %v1978_v51 }
0x11bb   :  { %v1975_v54 = vpop.xlane.xlu1 %1974 }
0x11bc   :  { %v1982_v50 = vsub.f32 %v1971_v16, %v1980_v53  ;;  %v1979_v48 = vmul.f32 0.03125, %v1975_v54 }
0x11be   :  { %v1981_v34 = vsub.f32 %v1970_v19, %v1979_v48  ;;  %v1984_v6 = vmul.f32 %v1982_v50, %v1982_v50 }
0x11c0   :  { %v1988_v36 = vsel %vm141_vm0, %v1984_v6, 0.0  ;;  %v1983_v12 = vmul.f32 %v1981_v34, %v1981_v34 }
0x11c1   :  { %1989 = vadd.xlane.f32.xlu1 %v1988_v36 }
0x11c2   :  { %v1985_v61 = vsel %vm141_vm0, %v1983_v12, 0.0 }
0x11c3   :  { %1986 = vadd.xlane.f32.xlu0 %v1985_v61 }
0x11d9   :  { %2006 = vrot.lane.b32.xlu0 %v2083_v22, %s2635_s4 }
0x124a   :  { %v1990_v58 = vpop.xlane.xlu1 %1989 }
0x124b   :  { %v1992_v25 = vmul.f32 0.03125, %v1990_v58 }
0x124c   :  { %v1987_v40 = vpop.xlane.xlu0 %1986 }
0x124d   :  { %v1994_v42 = vadd.f32 1e-05, %v1992_v25  ;;  %v1991_v17 = vmul.f32 0.03125, %v1987_v40 }
0x124f   :  { %2514 = vrsqrt.f32 %v1994_v42  ;;  %v1993_v38 = vadd.f32 1e-05, %v1991_v17 }
0x1250   :  { %v2007_v39 = vpop.permute.xlu0 %2006 }
0x1251   :  { %2516 = vrsqrt.f32 %v1993_v38 }
0x125c   :  { %v2515_v57 = vpop.eup %2514 }
0x125d   :  { %v1998_v60 = vmul.f32 %v2515_v57, %v1982_v50 }
0x125e   :  { %v2517_v62 = vpop.eup %2516 }
0x125f   :  { %v1997_v2 = vmul.f32 %v2517_v62, %v1981_v34  ;;  %v2004_v0 = vmul.f32 %v2083_v22, %v1998_v60 }
0x1261   :  { %v2003_v1 = vmul.f32 %v2083_v22, %v1997_v2  ;;  %v2010_v5 = vadd.f32 %v2007_v39, %v2004_v0 }
0x1263   :  { %v2009_v3 = vadd.f32 %v2007_v39, %v2003_v1  ;;  %2012 = vst.msk [vmem:[#allocation10 + $0x8] sm:$0xff] %vm141_vm0, %v2010_v5 }
0x1265   :  { %2011 = vst.msk [vmem:[#allocation10] sm:$0xff] %vm141_vm0, %v2009_v3 }
0x1266   :  { %2609 = shalt.err (!%p2606_p10)
}
0x1267   :  { %2024 = dma.vmem_to_hbm [thread:$0]  %s2019_s18, 256, %s3193_s5, [#allocation4], %s2628_s23, %s2628_s23, %s2629_s24  }
0x1268   :  { %2624 = dma.done.wait [#allocation4], 256  }
0x1269   :  { %2625 = vsyncadd [#allocation4], 4294967040 }
0x126a   :  { %2028 = vsyncpa [#allocation3], 1 }
0x126b   :  { %2029 = vsyncpa [#allocation6], 1 }
0x126c   :  { %2030 = vsyncpa [#allocation9], 1 }
0x126d   :  { %2031 = vsyncpa [#allocation4], 1 }

</bundles_post_ra>
